<compile_context>
chip_gen: v5e
topology: v5e:2x2
jax: 0.10.0
libtpu: 0.0.40
codegen_flags: <defaults>
</compile_context>

<pallas_src>
import functools
import math

import jax
import jax.numpy as jnp
import numpy as np
from jax.experimental import pallas as pl
from jax.experimental.pallas import tpu as pltpu


# ----------------------------- fused conv kernel -----------------------------

def conv3x3_bn_act(x, w9, bias, *, stride, relu, store_pre=False,
                   residual=None, residual_mode=None, res_w=None,
                   out_dtype=jnp.bfloat16, pre_dtype=jnp.float32):
    """3x3 conv (pad=1) + folded-BN bias (+shortcut) (+ReLU) as ONE pallas_call.

    x        : (N, H, W, Cin) NHWC activations
    w9       : (9, Cin, Cout) BN-scale-folded weights (tap-major: dh*3+dw)
    bias     : (Cout,)        folded BN bias (f32)
    residual : optional shortcut input
                 residual_mode == "add"    -> (N, Ho, Wo, Cout), f32 epilogue add
                 residual_mode == "matmul" -> (N, Ho, Wo, Cr), extra 1x1 tap
                                              with weights res_w (Cr, Cout)
    """
    assert residual_mode in (None, "add", "matmul")
    N, H, W, Cin = x.shape
    KK, Cin_w, Cout = w9.shape
    assert KK == 9 and Cin_w == Cin
    Ho = (H + 2 - 3) // stride + 1
    Wo = (W + 2 - 3) // stride + 1
    M = Ho * Wo

    # ---- stride-phase views of the zero-padded input (JAX level, ~1x copy) ---
    xp = jnp.pad(x.astype(jnp.bfloat16), ((0, 0), (1, 1), (1, 1), (0, 0)))
    tap_plan, need = [], {}
    for dh in range(3):
        for dw in range(3):
            key = (dh % stride, dw % stride)
            qh, qw = dh // stride, dw // stride
            tap_plan.append((dh * 3 + dw, key, qh, qw))
            mh, mw = need.get(key, (0, 0))
            need[key] = (max(mh, qh), max(mw, qw))
    phase_keys = sorted(need)
    phases = []
    for (a, b) in phase_keys:
        mh, mw = need[(a, b)]
        ph = xp[:, a::stride, b::stride, :][:, :Ho + mh, :Wo + mw, :]
        pad_h, pad_w = Ho + mh - ph.shape[1], Wo + mw - ph.shape[2]
        if pad_h or pad_w:
            ph = jnp.pad(ph, ((0, 0), (0, pad_h), (0, pad_w), (0, 0)))
        phases.append(ph)
    phase_idx = {k: i for i, k in enumerate(phase_keys)}
    taps = [(t, phase_idx[k], qh, qw) for (t, k, qh, qw) in tap_plan]
    n_phase = len(phases)

    has_res_add = residual_mode == "add"
    has_res_mm = residual_mode == "matmul"
    if has_res_add:
        res_flat = residual.reshape(N, M, Cout).astype(jnp.float32)
    elif has_res_mm:
        Cr = residual.shape[-1]
        res_flat = residual.reshape(N, M, Cr).astype(jnp.bfloat16)
        res_w = res_w.astype(jnp.bfloat16)

    w9 = w9.astype(jnp.bfloat16)
    bias2d = bias.reshape(1, Cout).astype(jnp.float32)

    # ---------------------------- kernel body --------------------------------
    def kernel(*refs):
        i = 0
        ph_refs = refs[i:i + n_phase]; i += n_phase
        w_ref = refs[i]; i += 1
        b_ref = refs[i]; i += 1
        res_ref = rw_ref = None
        if has_res_mm:
            res_ref = refs[i]; i += 1
            rw_ref = refs[i]; i += 1
        elif has_res_add:
            res_ref = refs[i]; i += 1
        out_ref = refs[i]; i += 1
        pre_ref = refs[i] if store_pre else None

        imgs = [r[0] for r in ph_refs]                    # each (Hph, Wph, Cin)
        acc = jnp.zeros((M, Cout), jnp.float32)
        for (t, p, qh, qw) in taps:                       # statically unrolled
            win = imgs[p][qh:qh + Ho, qw:qw + Wo, :]
            acc = acc + jnp.dot(win.reshape(M, Cin), w_ref[t],
                                preferred_element_type=jnp.float32)
        if has_res_mm:                                    # projection shortcut
            acc = acc + jnp.dot(res_ref[0], rw_ref[...],
                                preferred_element_type=jnp.float32)
        y = acc + b_ref[...]
        if has_res_add:                                   # identity shortcut, f32
            y = y + res_ref[0]
        if store_pre:
            pre_ref[0] = y.astype(pre_ref.dtype)
        if relu:
            y = jnp.maximum(y, 0.0)
        out_ref[0] = y.astype(out_ref.dtype)

    # ------------------------------ specs -----------------------------------
    in_specs = [pl.BlockSpec((1,) + ph.shape[1:], lambda n: (n, 0, 0, 0))
                for ph in phases]
    inputs = list(phases)
    in_specs.append(pl.BlockSpec(w9.shape, lambda n: (0, 0, 0)))   # resident W
    inputs.append(w9)
    in_specs.append(pl.BlockSpec((1, Cout), lambda n: (0, 0)))
    inputs.append(bias2d)
    if has_res_mm:
        in_specs.append(pl.BlockSpec((1, M, res_flat.shape[-1]),
                                     lambda n: (n, 0, 0)))
        inputs.append(res_flat)
        in_specs.append(pl.BlockSpec(res_w.shape, lambda n: (0, 0)))
        inputs.append(res_w)
    elif has_res_add:
        in_specs.append(pl.BlockSpec((1, M, Cout), lambda n: (n, 0, 0)))
        inputs.append(res_flat)

    if store_pre:
        out_shape = (jax.ShapeDtypeStruct((N, M, Cout), out_dtype),
                     jax.ShapeDtypeStruct((N, M, Cout), pre_dtype))
        out_specs = (pl.BlockSpec((1, M, Cout), lambda n: (n, 0, 0)),
                     pl.BlockSpec((1, M, Cout), lambda n: (n, 0, 0)))
    else:
        out_shape = jax.ShapeDtypeStruct((N, M, Cout), out_dtype)
        out_specs = pl.BlockSpec((1, M, Cout), lambda n: (n, 0, 0))

    outs = pl.pallas_call(
        kernel,
        grid=(N,),
        in_specs=in_specs,
        out_specs=out_specs,
        out_shape=out_shape,
        compiler_params=pltpu.CompilerParams(
            dimension_semantics=("parallel",),          # batch blocks -> megacore
            vmem_limit_bytes=48 * 1024 * 1024),         # safe on v7x's 64 MiB too
    )(*inputs)

    if store_pre:
        out_flat, pre_flat = outs
        return (out_flat.reshape(N, Ho, Wo, Cout),
                pre_flat.reshape(N, Ho, Wo, Cout))
    return outs.reshape(N, Ho, Wo, Cout)


# --------------------- parameter prep (done once, hoisted) -------------------

def _fold_bn(w, gamma, beta, mean, var, eps=1e-5):
    scale = gamma / jnp.sqrt(var + eps)
    return w * scale, beta - mean * scale


def prepare_block_params(p, *, eps=1e-5):
    """Fold BN into weights, reshape to tap-major, cast bf16. Call once."""
    prep = {}
    w1, b1 = _fold_bn(p["w1"], p["g1"], p["b1"], p["m1"], p["v1"], eps)
    _, _, cin, planes = p["w1"].shape
    prep["w1"] = w1.reshape(9, cin, planes).astype(jnp.bfloat16)
    prep["b1"] = b1.astype(jnp.float32)

    w2, b2 = _fold_bn(p["w2"], p["g2"], p["b2"], p["m2"], p["v2"], eps)
    prep["w2"] = w2.reshape(9, planes, planes).astype(jnp.bfloat16)
    bias2 = b2
    if "wsc" in p:
        wsc, bsc = _fold_bn(p["wsc"], p["gsc"], p["bsc"], p["msc"], p["vsc"], eps)
        prep["wsc"] = wsc.reshape(cin, planes).astype(jnp.bfloat16)
        bias2 = bias2 + bsc
    prep["b2"] = bias2.astype(jnp.float32)
    return prep


# ------------------------------ block forward --------------------------------

def basic_block_forward(x_nchw, prep, *, stride, is_last,
                        out_dtype=jnp.bfloat16, pre_dtype=jnp.float32):
    """Pallas implementation of BasicBlock.forward (NCHW in/out)."""
    x = jnp.transpose(x_nchw, (0, 2, 3, 1)).astype(jnp.float32)     # -> NHWC

    # conv1 (3x3, stride) + bn1 + relu
    out1 = conv3x3_bn_act(x, prep["w1"], prep["b1"], stride=stride,
                          relu=True, out_dtype=jnp.bfloat16)

    # conv2 (3x3) + bn2 + shortcut (+relu), fused in one kernel
    if "wsc" in prep:
        res = x[:, ::stride, ::stride, :]                 # 1x1-conv input
        res_mode, res_w = "matmul", prep["wsc"]
    else:
        res = x                                           # identity, f32 add
        res_mode, res_w = "add", None

    outs = conv3x3_bn_act(out1, prep["w2"], prep["b2"], stride=1, relu=True,
                          store_pre=is_last, residual=res,
                          residual_mode=res_mode, res_w=res_w,
                          out_dtype=out_dtype, pre_dtype=pre_dtype)
    if is_last:
        out, pre = outs
        return (jnp.transpose(out, (0, 3, 1, 2)),
                jnp.transpose(pre, (0, 3, 1, 2)))
    return jnp.transpose(outs, (0, 3, 1, 2))


# ------------------------- pure-JAX reference --------------------------------

def reference_forward(x_nchw, p, *, stride, is_last, eps=1e-5):
    x = jnp.transpose(x_nchw, (0, 2, 3, 1)).astype(jnp.float32)

    def conv(x, w, s, pad):
        return jax.lax.conv_general_dilated(
            x, w, (s, s), pad, dimension_numbers=("NHWC", "HWIO", "NHWC"))

    def bn(y, g, b, m, v):
        return (y - m) / jnp.sqrt(v + eps) * g + b

    out = jax.nn.relu(bn(conv(x, p["w1"], stride, ((1, 1), (1, 1))),
                         p["g1"], p["b1"], p["m1"], p["v1"]))
    out = bn(conv(out, p["w2"], 1, ((1, 1), (1, 1))),
             p["g2"], p["b2"], p["m2"], p["v2"])
    if "wsc" in p:
        sc = bn(conv(x, p["wsc"], stride, ((0, 0), (0, 0))),
                p["gsc"], p["bsc"], p["msc"], p["vsc"])
    else:
        sc = x
    pre = out + sc
    out = jax.nn.relu(pre)
    out = jnp.transpose(out, (0, 3, 1, 2))
    pre = jnp.transpose(pre, (0, 3, 1, 2))
    return (out, pre) if is_last else out


# ---------------------------------- main -------------------------------------

def init_params(key, in_planes, planes, stride):
    ks = jax.random.split(key, 16)
    p = {}
    p["w1"] = (jax.random.normal(ks[0], (3, 3, in_planes, planes), jnp.float32)
               * (1.0 / math.sqrt(9 * in_planes)))
    p["w2"] = (jax.random.normal(ks[1], (3, 3, planes, planes), jnp.float32)
               * (1.0 / math.sqrt(9 * planes)))
    p["g1"] = 1.0 + 0.1 * jax.random.normal(ks[2], (planes,), jnp.float32)
    p["b1"] = 0.1 * jax.random.normal(ks[3], (planes,), jnp.float32)
    p["m1"] = 0.1 * jax.random.normal(ks[4], (planes,), jnp.float32)
    p["v1"] = jax.random.uniform(ks[5], (planes,), jnp.float32, 0.5, 1.5)
    p["g2"] = 1.0 + 0.1 * jax.random.normal(ks[6], (planes,), jnp.float32)
    p["b2"] = 0.1 * jax.random.normal(ks[7], (planes,), jnp.float32)
    p["m2"] = 0.1 * jax.random.normal(ks[8], (planes,), jnp.float32)
    p["v2"] = jax.random.uniform(ks[9], (planes,), jnp.float32, 0.5, 1.5)
    if stride != 1 or in_planes != planes:
        p["wsc"] = (jax.random.normal(ks[10], (1, 1, in_planes, planes),
                                      jnp.float32)
                    * (1.0 / math.sqrt(in_planes)))
        p["gsc"] = 1.0 + 0.1 * jax.random.normal(ks[11], (planes,), jnp.float32)
        p["bsc"] = 0.1 * jax.random.normal(ks[12], (planes,), jnp.float32)
        p["msc"] = 0.1 * jax.random.normal(ks[13], (planes,), jnp.float32)
        p["vsc"] = jax.random.uniform(ks[14], (planes,), jnp.float32, 0.5, 1.5)
    return p


if __name__ == "__main__":
    key = jax.random.PRNGKey(0)
    N, H, W = 2, 16, 16

    configs = [
        # projection shortcut (stride 2, channel change) + preact output
        dict(in_planes=4, planes=8, stride=2, is_last=True),
        # identity shortcut, no preact output
        dict(in_planes=8, planes=8, stride=1, is_last=False),
    ]

    def to_np(a):
        return np.asarray(a).astype(np.float32)

    for cfg in configs:
        key, k_param, k_x = jax.random.split(key, 3)
        params = init_params(k_param, cfg["in_planes"], cfg["planes"],
                             cfg["stride"])
        prep = prepare_block_params(params)       # hoisted weight-side prep
        x = jax.random.normal(k_x, (N, cfg["in_planes"], H, W), jnp.float32)

        fwd = jax.jit(functools.partial(basic_block_forward,
                                        stride=cfg["stride"],
                                        is_last=cfg["is_last"]))
        res = jax.block_until_ready(fwd(x, prep))
        ref = reference_forward(x, params, stride=cfg["stride"],
                                is_last=cfg["is_last"])

        # bf16 MXU inputs / bf16 out store -> slightly loose tolerance.
        if cfg["is_last"]:
            out, pre = res
            ref_out, ref_pre = ref
            np.testing.assert_allclose(to_np(out), to_np(ref_out),
                                       rtol=5e-2, atol=5e-2)
            np.testing.assert_allclose(to_np(pre), to_np(ref_pre),
                                       rtol=5e-2, atol=5e-2)
        else:
            np.testing.assert_allclose(to_np(res), to_np(ref),
                                       rtol=5e-2, atol=5e-2)

    print("KERNEL_OK")
</pallas_src>

<mosaic_0001>
module attributes {stable_mosaic.version = 11 : i64} {
  func.func @kernel(%arg0: i32, %arg1: memref<1x9x9x4xbf16, #tpu.memory_space<vmem>>, %arg2: memref<1x9x8x4xbf16, #tpu.memory_space<vmem>>, %arg3: memref<1x8x9x4xbf16, #tpu.memory_space<vmem>>, %arg4: memref<1x8x8x4xbf16, #tpu.memory_space<vmem>>, %arg5: memref<9x4x8xbf16, #tpu.memory_space<vmem>>, %arg6: memref<1x8xf32, #tpu.memory_space<vmem>>, %arg7: memref<1x64x8xbf16, #tpu.memory_space<vmem>>) attributes {dimension_semantics = [#tpu.dimension_semantics<parallel>], iteration_bounds = array<i64: 2>, scalar_prefetch = 0 : i64, scratch_operands = 0 : i64, tpu.core_type = #tpu.core_type<tc>, window_params = [{transform_indices = @transform_0, window_bounds = array<i64: 1, 9, 9, 4>}, {transform_indices = @transform_1, window_bounds = array<i64: 1, 9, 8, 4>}, {transform_indices = @transform_2, window_bounds = array<i64: 1, 8, 9, 4>}, {transform_indices = @transform_3, window_bounds = array<i64: 1, 8, 8, 4>}, {pipeline_mode = #tpu.pipeline_mode<synchronous>, transform_indices = @transform_4, window_bounds = array<i64: 9, 4, 8>}, {pipeline_mode = #tpu.pipeline_mode<synchronous>, transform_indices = @transform_5, window_bounds = array<i64: 1, 8>}, {transform_indices = @transform_6, window_bounds = array<i64: 1, 64, 8>}]} {
    %c0 = arith.constant 0 : index
    %c0_0 = arith.constant 0 : index
    %c0_1 = arith.constant 0 : index
    %c0_2 = arith.constant 0 : index
    %0 = vector.load %arg1[%c0, %c0_0, %c0_1, %c0_2] : memref<1x9x9x4xbf16, #tpu.memory_space<vmem>>, vector<1x9x9x4xbf16>
    %1 = vector.shape_cast %0 : vector<1x9x9x4xbf16> to vector<9x9x4xbf16>
    %c0_3 = arith.constant 0 : index
    %c0_4 = arith.constant 0 : index
    %c0_5 = arith.constant 0 : index
    %c0_6 = arith.constant 0 : index
    %2 = vector.load %arg2[%c0_3, %c0_4, %c0_5, %c0_6] : memref<1x9x8x4xbf16, #tpu.memory_space<vmem>>, vector<1x9x8x4xbf16>
    %3 = vector.shape_cast %2 : vector<1x9x8x4xbf16> to vector<9x8x4xbf16>
    %c0_7 = arith.constant 0 : index
    %c0_8 = arith.constant 0 : index
    %c0_9 = arith.constant 0 : index
    %c0_10 = arith.constant 0 : index
    %4 = vector.load %arg3[%c0_7, %c0_8, %c0_9, %c0_10] : memref<1x8x9x4xbf16, #tpu.memory_space<vmem>>, vector<1x8x9x4xbf16>
    %5 = vector.shape_cast %4 : vector<1x8x9x4xbf16> to vector<8x9x4xbf16>
    %c0_11 = arith.constant 0 : index
    %c0_12 = arith.constant 0 : index
    %c0_13 = arith.constant 0 : index
    %c0_14 = arith.constant 0 : index
    %6 = vector.load %arg4[%c0_11, %c0_12, %c0_13, %c0_14] : memref<1x8x8x4xbf16, #tpu.memory_space<vmem>>, vector<1x8x8x4xbf16>
    %7 = vector.shape_cast %6 : vector<1x8x8x4xbf16> to vector<8x8x4xbf16>
    %cst = arith.constant 0.000000e+00 : f32
    %8 = vector.broadcast %cst : f32 to vector<64x8xf32>
    %9 = vector.extract_strided_slice %1 {offsets = [0, 0, 0], sizes = [8, 8, 4], strides = [1, 1, 1]} : vector<9x9x4xbf16> to vector<8x8x4xbf16>
    %10 = vector.shape_cast %9 : vector<8x8x4xbf16> to vector<64x4xbf16>
    %c0_15 = arith.constant 0 : index
    %c0_16 = arith.constant 0 : index
    %c0_17 = arith.constant 0 : index
    %11 = vector.load %arg5[%c0_15, %c0_16, %c0_17] : memref<9x4x8xbf16, #tpu.memory_space<vmem>>, vector<1x4x8xbf16>
    %12 = vector.shape_cast %11 : vector<1x4x8xbf16> to vector<4x8xbf16>
    %cst_18 = arith.constant dense<0.000000e+00> : vector<64x8xf32>
    %13 = tpu.matmul %10, %12, %cst_18 {dimension_numbers = #tpu.dot_dimension_numbers<[1], [0], [0], [1], [0, 0, 1, 1], [], []>} : vector<64x4xbf16>, vector<4x8xbf16>, vector<64x8xf32> -> vector<64x8xf32>
    %14 = arith.addf %8, %13 : vector<64x8xf32>
    %15 = vector.extract_strided_slice %3 {offsets = [0, 0, 0], sizes = [8, 8, 4], strides = [1, 1, 1]} : vector<9x8x4xbf16> to vector<8x8x4xbf16>
    %16 = vector.shape_cast %15 : vector<8x8x4xbf16> to vector<64x4xbf16>
    %c1 = arith.constant 1 : index
    %c0_19 = arith.constant 0 : index
    %c0_20 = arith.constant 0 : index
    %17 = vector.load %arg5[%c1, %c0_19, %c0_20] : memref<9x4x8xbf16, #tpu.memory_space<vmem>>, vector<1x4x8xbf16>
    %18 = vector.shape_cast %17 : vector<1x4x8xbf16> to vector<4x8xbf16>
    %cst_21 = arith.constant dense<0.000000e+00> : vector<64x8xf32>
    %19 = tpu.matmul %16, %18, %cst_21 {dimension_numbers = #tpu.dot_dimension_numbers<[1], [0], [0], [1], [0, 0, 1, 1], [], []>} : vector<64x4xbf16>, vector<4x8xbf16>, vector<64x8xf32> -> vector<64x8xf32>
    %20 = arith.addf %14, %19 : vector<64x8xf32>
    %21 = vector.extract_strided_slice %1 {offsets = [0, 1, 0], sizes = [8, 8, 4], strides = [1, 1, 1]} : vector<9x9x4xbf16> to vector<8x8x4xbf16>
    %22 = vector.shape_cast %21 : vector<8x8x4xbf16> to vector<64x4xbf16>
    %c2 = arith.constant 2 : index
    %c0_22 = arith.constant 0 : index
    %c0_23 = arith.constant 0 : index
    %23 = vector.load %arg5[%c2, %c0_22, %c0_23] : memref<9x4x8xbf16, #tpu.memory_space<vmem>>, vector<1x4x8xbf16>
    %24 = vector.shape_cast %23 : vector<1x4x8xbf16> to vector<4x8xbf16>
    %cst_24 = arith.constant dense<0.000000e+00> : vector<64x8xf32>
    %25 = tpu.matmul %22, %24, %cst_24 {dimension_numbers = #tpu.dot_dimension_numbers<[1], [0], [0], [1], [0, 0, 1, 1], [], []>} : vector<64x4xbf16>, vector<4x8xbf16>, vector<64x8xf32> -> vector<64x8xf32>
    %26 = arith.addf %20, %25 : vector<64x8xf32>
    %27 = vector.extract_strided_slice %5 {offsets = [0, 0, 0], sizes = [8, 8, 4], strides = [1, 1, 1]} : vector<8x9x4xbf16> to vector<8x8x4xbf16>
    %28 = vector.shape_cast %27 : vector<8x8x4xbf16> to vector<64x4xbf16>
    %c3 = arith.constant 3 : index
    %c0_25 = arith.constant 0 : index
    %c0_26 = arith.constant 0 : index
    %29 = vector.load %arg5[%c3, %c0_25, %c0_26] : memref<9x4x8xbf16, #tpu.memory_space<vmem>>, vector<1x4x8xbf16>
    %30 = vector.shape_cast %29 : vector<1x4x8xbf16> to vector<4x8xbf16>
    %cst_27 = arith.constant dense<0.000000e+00> : vector<64x8xf32>
    %31 = tpu.matmul %28, %30, %cst_27 {dimension_numbers = #tpu.dot_dimension_numbers<[1], [0], [0], [1], [0, 0, 1, 1], [], []>} : vector<64x4xbf16>, vector<4x8xbf16>, vector<64x8xf32> -> vector<64x8xf32>
    %32 = arith.addf %26, %31 : vector<64x8xf32>
    %33 = vector.shape_cast %7 : vector<8x8x4xbf16> to vector<64x4xbf16>
    %c4 = arith.constant 4 : index
    %c0_28 = arith.constant 0 : index
    %c0_29 = arith.constant 0 : index
    %34 = vector.load %arg5[%c4, %c0_28, %c0_29] : memref<9x4x8xbf16, #tpu.memory_space<vmem>>, vector<1x4x8xbf16>
    %35 = vector.shape_cast %34 : vector<1x4x8xbf16> to vector<4x8xbf16>
    %cst_30 = arith.constant dense<0.000000e+00> : vector<64x8xf32>
    %36 = tpu.matmul %33, %35, %cst_30 {dimension_numbers = #tpu.dot_dimension_numbers<[1], [0], [0], [1], [0, 0, 1, 1], [], []>} : vector<64x4xbf16>, vector<4x8xbf16>, vector<64x8xf32> -> vector<64x8xf32>
    %37 = arith.addf %32, %36 : vector<64x8xf32>
    %38 = vector.extract_strided_slice %5 {offsets = [0, 1, 0], sizes = [8, 8, 4], strides = [1, 1, 1]} : vector<8x9x4xbf16> to vector<8x8x4xbf16>
    %39 = vector.shape_cast %38 : vector<8x8x4xbf16> to vector<64x4xbf16>
    %c5 = arith.constant 5 : index
    %c0_31 = arith.constant 0 : index
    %c0_32 = arith.constant 0 : index
    %40 = vector.load %arg5[%c5, %c0_31, %c0_32] : memref<9x4x8xbf16, #tpu.memory_space<vmem>>, vector<1x4x8xbf16>
    %41 = vector.shape_cast %40 : vector<1x4x8xbf16> to vector<4x8xbf16>
    %cst_33 = arith.constant dense<0.000000e+00> : vector<64x8xf32>
    %42 = tpu.matmul %39, %41, %cst_33 {dimension_numbers = #tpu.dot_dimension_numbers<[1], [0], [0], [1], [0, 0, 1, 1], [], []>} : vector<64x4xbf16>, vector<4x8xbf16>, vector<64x8xf32> -> vector<64x8xf32>
    %43 = arith.addf %37, %42 : vector<64x8xf32>
    %44 = vector.extract_strided_slice %1 {offsets = [1, 0, 0], sizes = [8, 8, 4], strides = [1, 1, 1]} : vector<9x9x4xbf16> to vector<8x8x4xbf16>
    %45 = vector.shape_cast %44 : vector<8x8x4xbf16> to vector<64x4xbf16>
    %c6 = arith.constant 6 : index
    %c0_34 = arith.constant 0 : index
    %c0_35 = arith.constant 0 : index
    %46 = vector.load %arg5[%c6, %c0_34, %c0_35] : memref<9x4x8xbf16, #tpu.memory_space<vmem>>, vector<1x4x8xbf16>
    %47 = vector.shape_cast %46 : vector<1x4x8xbf16> to vector<4x8xbf16>
    %cst_36 = arith.constant dense<0.000000e+00> : vector<64x8xf32>
    %48 = tpu.matmul %45, %47, %cst_36 {dimension_numbers = #tpu.dot_dimension_numbers<[1], [0], [0], [1], [0, 0, 1, 1], [], []>} : vector<64x4xbf16>, vector<4x8xbf16>, vector<64x8xf32> -> vector<64x8xf32>
    %49 = arith.addf %43, %48 : vector<64x8xf32>
    %50 = vector.extract_strided_slice %3 {offsets = [1, 0, 0], sizes = [8, 8, 4], strides = [1, 1, 1]} : vector<9x8x4xbf16> to vector<8x8x4xbf16>
    %51 = vector.shape_cast %50 : vector<8x8x4xbf16> to vector<64x4xbf16>
    %c7 = arith.constant 7 : index
    %c0_37 = arith.constant 0 : index
    %c0_38 = arith.constant 0 : index
    %52 = vector.load %arg5[%c7, %c0_37, %c0_38] : memref<9x4x8xbf16, #tpu.memory_space<vmem>>, vector<1x4x8xbf16>
    %53 = vector.shape_cast %52 : vector<1x4x8xbf16> to vector<4x8xbf16>
    %cst_39 = arith.constant dense<0.000000e+00> : vector<64x8xf32>
    %54 = tpu.matmul %51, %53, %cst_39 {dimension_numbers = #tpu.dot_dimension_numbers<[1], [0], [0], [1], [0, 0, 1, 1], [], []>} : vector<64x4xbf16>, vector<4x8xbf16>, vector<64x8xf32> -> vector<64x8xf32>
    %55 = arith.addf %49, %54 : vector<64x8xf32>
    %56 = vector.extract_strided_slice %1 {offsets = [1, 1, 0], sizes = [8, 8, 4], strides = [1, 1, 1]} : vector<9x9x4xbf16> to vector<8x8x4xbf16>
    %57 = vector.shape_cast %56 : vector<8x8x4xbf16> to vector<64x4xbf16>
    %c8 = arith.constant 8 : index
    %c0_40 = arith.constant 0 : index
    %c0_41 = arith.constant 0 : index
    %58 = vector.load %arg5[%c8, %c0_40, %c0_41] : memref<9x4x8xbf16, #tpu.memory_space<vmem>>, vector<1x4x8xbf16>
    %59 = vector.shape_cast %58 : vector<1x4x8xbf16> to vector<4x8xbf16>
    %cst_42 = arith.constant dense<0.000000e+00> : vector<64x8xf32>
    %60 = tpu.matmul %57, %59, %cst_42 {dimension_numbers = #tpu.dot_dimension_numbers<[1], [0], [0], [1], [0, 0, 1, 1], [], []>} : vector<64x4xbf16>, vector<4x8xbf16>, vector<64x8xf32> -> vector<64x8xf32>
    %61 = arith.addf %55, %60 : vector<64x8xf32>
    %c0_43 = arith.constant 0 : index
    %c0_44 = arith.constant 0 : index
    %62 = vector.load %arg6[%c0_43, %c0_44] : memref<1x8xf32, #tpu.memory_space<vmem>>, vector<1x8xf32>
    %63 = vector.broadcast %62 : vector<1x8xf32> to vector<64x8xf32>
    %64 = arith.addf %61, %63 : vector<64x8xf32>
    %cst_45 = arith.constant 0.000000e+00 : f32
    %65 = vector.broadcast %cst_45 : f32 to vector<64x8xf32>
    %66 = arith.maximumf %64, %65 : vector<64x8xf32>
    %67 = arith.truncf %66 : vector<64x8xf32> to vector<64x8xbf16>
    %c0_46 = arith.constant 0 : index
    %c0_47 = arith.constant 0 : index
    %c0_48 = arith.constant 0 : index
    %68 = vector.load %arg7[%c0_46, %c0_47, %c0_48] : memref<1x64x8xbf16, #tpu.memory_space<vmem>>, vector<1x64x8xbf16>
    %69 = vector.shape_cast %68 : vector<1x64x8xbf16> to vector<64x8xbf16>
    %70 = vector.shape_cast %67 : vector<64x8xbf16> to vector<1x64x8xbf16>
    tpu.vector_store %arg7[%c0_46, %c0_47, %c0_48], %70 {strides = array<i32>} : memref<1x64x8xbf16, #tpu.memory_space<vmem>>, vector<1x64x8xbf16>,
    return
  }
  func.func @transform_0(%arg0: i32) -> (i32, i32, i32, i32) {
    %c0_i32 = arith.constant 0 : i32
    %c0_i32_0 = arith.constant 0 : i32
    %c0_i32_1 = arith.constant 0 : i32
    %c0_i32_2 = arith.constant 0 : i32
    return %arg0, %c0_i32, %c0_i32_0, %c0_i32_1 : i32, i32, i32, i32
  }
  func.func @transform_1(%arg0: i32) -> (i32, i32, i32, i32) {
    %c0_i32 = arith.constant 0 : i32
    %c0_i32_0 = arith.constant 0 : i32
    %c0_i32_1 = arith.constant 0 : i32
    %c0_i32_2 = arith.constant 0 : i32
    return %arg0, %c0_i32, %c0_i32_0, %c0_i32_1 : i32, i32, i32, i32
  }
  func.func @transform_2(%arg0: i32) -> (i32, i32, i32, i32) {
    %c0_i32 = arith.constant 0 : i32
    %c0_i32_0 = arith.constant 0 : i32
    %c0_i32_1 = arith.constant 0 : i32
    %c0_i32_2 = arith.constant 0 : i32
    return %arg0, %c0_i32, %c0_i32_0, %c0_i32_1 : i32, i32, i32, i32
  }
  func.func @transform_3(%arg0: i32) -> (i32, i32, i32, i32) {
    %c0_i32 = arith.constant 0 : i32
    %c0_i32_0 = arith.constant 0 : i32
    %c0_i32_1 = arith.constant 0 : i32
    %c0_i32_2 = arith.constant 0 : i32
    return %arg0, %c0_i32, %c0_i32_0, %c0_i32_1 : i32, i32, i32, i32
  }
  func.func @transform_4(%arg0: i32) -> (i32, i32, i32) {
    %c0_i32 = arith.constant 0 : i32
    %c0_i32_0 = arith.constant 0 : i32
    %c0_i32_1 = arith.constant 0 : i32
    %c0_i32_2 = arith.constant 0 : i32
    return %c0_i32, %c0_i32_0, %c0_i32_1 : i32, i32, i32
  }
  func.func @transform_5(%arg0: i32) -> (i32, i32) {
    %c0_i32 = arith.constant 0 : i32
    %c0_i32_0 = arith.constant 0 : i32
    %c0_i32_1 = arith.constant 0 : i32
    return %c0_i32, %c0_i32_0 : i32, i32
  }
  func.func @transform_6(%arg0: i32) -> (i32, i32, i32) {
    %c0_i32 = arith.constant 0 : i32
    %c0_i32_0 = arith.constant 0 : i32
    %c0_i32_1 = arith.constant 0 : i32
    return %arg0, %c0_i32, %c0_i32_0 : i32, i32, i32
  }
}

module attributes {stable_mosaic.version = 11 : i64} {
  func.func @kernel(%arg0: i32, %arg1: memref<1x10x10x8xbf16, #tpu.memory_space<vmem>>, %arg2: memref<9x8x8xbf16, #tpu.memory_space<vmem>>, %arg3: memref<1x8xf32, #tpu.memory_space<vmem>>, %arg4: memref<1x64x4xbf16, #tpu.memory_space<vmem>>, %arg5: memref<4x8xbf16, #tpu.memory_space<vmem>>, %arg6: memref<1x64x8xbf16, #tpu.memory_space<vmem>>, %arg7: memref<1x64x8xf32, #tpu.memory_space<vmem>>) attributes {dimension_semantics = [#tpu.dimension_semantics<parallel>], iteration_bounds = array<i64: 2>, scalar_prefetch = 0 : i64, scratch_operands = 0 : i64, tpu.core_type = #tpu.core_type<tc>, window_params = [{transform_indices = @transform_0, window_bounds = array<i64: 1, 10, 10, 8>}, {pipeline_mode = #tpu.pipeline_mode<synchronous>, transform_indices = @transform_1, window_bounds = array<i64: 9, 8, 8>}, {pipeline_mode = #tpu.pipeline_mode<synchronous>, transform_indices = @transform_2, window_bounds = array<i64: 1, 8>}, {transform_indices = @transform_3, window_bounds = array<i64: 1, 64, 4>}, {pipeline_mode = #tpu.pipeline_mode<synchronous>, transform_indices = @transform_4, window_bounds = array<i64: 4, 8>}, {transform_indices = @transform_5, window_bounds = array<i64: 1, 64, 8>}, {transform_indices = @transform_6, window_bounds = array<i64: 1, 64, 8>}]} {
    %c0 = arith.constant 0 : index
    %c0_0 = arith.constant 0 : index
    %c0_1 = arith.constant 0 : index
    %c0_2 = arith.constant 0 : index
    %0 = vector.load %arg1[%c0, %c0_0, %c0_1, %c0_2] : memref<1x10x10x8xbf16, #tpu.memory_space<vmem>>, vector<1x10x10x8xbf16>
    %1 = vector.shape_cast %0 : vector<1x10x10x8xbf16> to vector<10x10x8xbf16>
    %cst = arith.constant 0.000000e+00 : f32
    %2 = vector.broadcast %cst : f32 to vector<64x8xf32>
    %3 = vector.extract_strided_slice %1 {offsets = [0, 0, 0], sizes = [8, 8, 8], strides = [1, 1, 1]} : vector<10x10x8xbf16> to vector<8x8x8xbf16>
    %4 = vector.shape_cast %3 : vector<8x8x8xbf16> to vector<64x8xbf16>
    %c0_3 = arith.constant 0 : index
    %c0_4 = arith.constant 0 : index
    %c0_5 = arith.constant 0 : index
    %5 = vector.load %arg2[%c0_3, %c0_4, %c0_5] : memref<9x8x8xbf16, #tpu.memory_space<vmem>>, vector<1x8x8xbf16>
    %6 = vector.shape_cast %5 : vector<1x8x8xbf16> to vector<8x8xbf16>
    %cst_6 = arith.constant dense<0.000000e+00> : vector<64x8xf32>
    %7 = tpu.matmul %4, %6, %cst_6 {dimension_numbers = #tpu.dot_dimension_numbers<[1], [0], [0], [1], [0, 0, 1, 1], [], []>} : vector<64x8xbf16>, vector<8x8xbf16>, vector<64x8xf32> -> vector<64x8xf32>
    %8 = arith.addf %2, %7 : vector<64x8xf32>
    %9 = vector.extract_strided_slice %1 {offsets = [0, 1, 0], sizes = [8, 8, 8], strides = [1, 1, 1]} : vector<10x10x8xbf16> to vector<8x8x8xbf16>
    %10 = vector.shape_cast %9 : vector<8x8x8xbf16> to vector<64x8xbf16>
    %c1 = arith.constant 1 : index
    %c0_7 = arith.constant 0 : index
    %c0_8 = arith.constant 0 : index
    %11 = vector.load %arg2[%c1, %c0_7, %c0_8] : memref<9x8x8xbf16, #tpu.memory_space<vmem>>, vector<1x8x8xbf16>
    %12 = vector.shape_cast %11 : vector<1x8x8xbf16> to vector<8x8xbf16>
    %cst_9 = arith.constant dense<0.000000e+00> : vector<64x8xf32>
    %13 = tpu.matmul %10, %12, %cst_9 {dimension_numbers = #tpu.dot_dimension_numbers<[1], [0], [0], [1], [0, 0, 1, 1], [], []>} : vector<64x8xbf16>, vector<8x8xbf16>, vector<64x8xf32> -> vector<64x8xf32>
    %14 = arith.addf %8, %13 : vector<64x8xf32>
    %15 = vector.extract_strided_slice %1 {offsets = [0, 2, 0], sizes = [8, 8, 8], strides = [1, 1, 1]} : vector<10x10x8xbf16> to vector<8x8x8xbf16>
    %16 = vector.shape_cast %15 : vector<8x8x8xbf16> to vector<64x8xbf16>
    %c2 = arith.constant 2 : index
    %c0_10 = arith.constant 0 : index
    %c0_11 = arith.constant 0 : index
    %17 = vector.load %arg2[%c2, %c0_10, %c0_11] : memref<9x8x8xbf16, #tpu.memory_space<vmem>>, vector<1x8x8xbf16>
    %18 = vector.shape_cast %17 : vector<1x8x8xbf16> to vector<8x8xbf16>
    %cst_12 = arith.constant dense<0.000000e+00> : vector<64x8xf32>
    %19 = tpu.matmul %16, %18, %cst_12 {dimension_numbers = #tpu.dot_dimension_numbers<[1], [0], [0], [1], [0, 0, 1, 1], [], []>} : vector<64x8xbf16>, vector<8x8xbf16>, vector<64x8xf32> -> vector<64x8xf32>
    %20 = arith.addf %14, %19 : vector<64x8xf32>
    %21 = vector.extract_strided_slice %1 {offsets = [1, 0, 0], sizes = [8, 8, 8], strides = [1, 1, 1]} : vector<10x10x8xbf16> to vector<8x8x8xbf16>
    %22 = vector.shape_cast %21 : vector<8x8x8xbf16> to vector<64x8xbf16>
    %c3 = arith.constant 3 : index
    %c0_13 = arith.constant 0 : index
    %c0_14 = arith.constant 0 : index
    %23 = vector.load %arg2[%c3, %c0_13, %c0_14] : memref<9x8x8xbf16, #tpu.memory_space<vmem>>, vector<1x8x8xbf16>
    %24 = vector.shape_cast %23 : vector<1x8x8xbf16> to vector<8x8xbf16>
    %cst_15 = arith.constant dense<0.000000e+00> : vector<64x8xf32>
    %25 = tpu.matmul %22, %24, %cst_15 {dimension_numbers = #tpu.dot_dimension_numbers<[1], [0], [0], [1], [0, 0, 1, 1], [], []>} : vector<64x8xbf16>, vector<8x8xbf16>, vector<64x8xf32> -> vector<64x8xf32>
    %26 = arith.addf %20, %25 : vector<64x8xf32>
    %27 = vector.extract_strided_slice %1 {offsets = [1, 1, 0], sizes = [8, 8, 8], strides = [1, 1, 1]} : vector<10x10x8xbf16> to vector<8x8x8xbf16>
    %28 = vector.shape_cast %27 : vector<8x8x8xbf16> to vector<64x8xbf16>
    %c4 = arith.constant 4 : index
    %c0_16 = arith.constant 0 : index
    %c0_17 = arith.constant 0 : index
    %29 = vector.load %arg2[%c4, %c0_16, %c0_17] : memref<9x8x8xbf16, #tpu.memory_space<vmem>>, vector<1x8x8xbf16>
    %30 = vector.shape_cast %29 : vector<1x8x8xbf16> to vector<8x8xbf16>
    %cst_18 = arith.constant dense<0.000000e+00> : vector<64x8xf32>
    %31 = tpu.matmul %28, %30, %cst_18 {dimension_numbers = #tpu.dot_dimension_numbers<[1], [0], [0], [1], [0, 0, 1, 1], [], []>} : vector<64x8xbf16>, vector<8x8xbf16>, vector<64x8xf32> -> vector<64x8xf32>
    %32 = arith.addf %26, %31 : vector<64x8xf32>
    %33 = vector.extract_strided_slice %1 {offsets = [1, 2, 0], sizes = [8, 8, 8], strides = [1, 1, 1]} : vector<10x10x8xbf16> to vector<8x8x8xbf16>
    %34 = vector.shape_cast %33 : vector<8x8x8xbf16> to vector<64x8xbf16>
    %c5 = arith.constant 5 : index
    %c0_19 = arith.constant 0 : index
    %c0_20 = arith.constant 0 : index
    %35 = vector.load %arg2[%c5, %c0_19, %c0_20] : memref<9x8x8xbf16, #tpu.memory_space<vmem>>, vector<1x8x8xbf16>
    %36 = vector.shape_cast %35 : vector<1x8x8xbf16> to vector<8x8xbf16>
    %cst_21 = arith.constant dense<0.000000e+00> : vector<64x8xf32>
    %37 = tpu.matmul %34, %36, %cst_21 {dimension_numbers = #tpu.dot_dimension_numbers<[1], [0], [0], [1], [0, 0, 1, 1], [], []>} : vector<64x8xbf16>, vector<8x8xbf16>, vector<64x8xf32> -> vector<64x8xf32>
    %38 = arith.addf %32, %37 : vector<64x8xf32>
    %39 = vector.extract_strided_slice %1 {offsets = [2, 0, 0], sizes = [8, 8, 8], strides = [1, 1, 1]} : vector<10x10x8xbf16> to vector<8x8x8xbf16>
    %40 = vector.shape_cast %39 : vector<8x8x8xbf16> to vector<64x8xbf16>
    %c6 = arith.constant 6 : index
    %c0_22 = arith.constant 0 : index
    %c0_23 = arith.constant 0 : index
    %41 = vector.load %arg2[%c6, %c0_22, %c0_23] : memref<9x8x8xbf16, #tpu.memory_space<vmem>>, vector<1x8x8xbf16>
    %42 = vector.shape_cast %41 : vector<1x8x8xbf16> to vector<8x8xbf16>
    %cst_24 = arith.constant dense<0.000000e+00> : vector<64x8xf32>
    %43 = tpu.matmul %40, %42, %cst_24 {dimension_numbers = #tpu.dot_dimension_numbers<[1], [0], [0], [1], [0, 0, 1, 1], [], []>} : vector<64x8xbf16>, vector<8x8xbf16>, vector<64x8xf32> -> vector<64x8xf32>
    %44 = arith.addf %38, %43 : vector<64x8xf32>
    %45 = vector.extract_strided_slice %1 {offsets = [2, 1, 0], sizes = [8, 8, 8], strides = [1, 1, 1]} : vector<10x10x8xbf16> to vector<8x8x8xbf16>
    %46 = vector.shape_cast %45 : vector<8x8x8xbf16> to vector<64x8xbf16>
    %c7 = arith.constant 7 : index
    %c0_25 = arith.constant 0 : index
    %c0_26 = arith.constant 0 : index
    %47 = vector.load %arg2[%c7, %c0_25, %c0_26] : memref<9x8x8xbf16, #tpu.memory_space<vmem>>, vector<1x8x8xbf16>
    %48 = vector.shape_cast %47 : vector<1x8x8xbf16> to vector<8x8xbf16>
    %cst_27 = arith.constant dense<0.000000e+00> : vector<64x8xf32>
    %49 = tpu.matmul %46, %48, %cst_27 {dimension_numbers = #tpu.dot_dimension_numbers<[1], [0], [0], [1], [0, 0, 1, 1], [], []>} : vector<64x8xbf16>, vector<8x8xbf16>, vector<64x8xf32> -> vector<64x8xf32>
    %50 = arith.addf %44, %49 : vector<64x8xf32>
    %51 = vector.extract_strided_slice %1 {offsets = [2, 2, 0], sizes = [8, 8, 8], strides = [1, 1, 1]} : vector<10x10x8xbf16> to vector<8x8x8xbf16>
    %52 = vector.shape_cast %51 : vector<8x8x8xbf16> to vector<64x8xbf16>
    %c8 = arith.constant 8 : index
    %c0_28 = arith.constant 0 : index
    %c0_29 = arith.constant 0 : index
    %53 = vector.load %arg2[%c8, %c0_28, %c0_29] : memref<9x8x8xbf16, #tpu.memory_space<vmem>>, vector<1x8x8xbf16>
    %54 = vector.shape_cast %53 : vector<1x8x8xbf16> to vector<8x8xbf16>
    %cst_30 = arith.constant dense<0.000000e+00> : vector<64x8xf32>
    %55 = tpu.matmul %52, %54, %cst_30 {dimension_numbers = #tpu.dot_dimension_numbers<[1], [0], [0], [1], [0, 0, 1, 1], [], []>} : vector<64x8xbf16>, vector<8x8xbf16>, vector<64x8xf32> -> vector<64x8xf32>
    %56 = arith.addf %50, %55 : vector<64x8xf32>
    %c0_31 = arith.constant 0 : index
    %c0_32 = arith.constant 0 : index
    %c0_33 = arith.constant 0 : index
    %57 = vector.load %arg4[%c0_31, %c0_32, %c0_33] : memref<1x64x4xbf16, #tpu.memory_space<vmem>>, vector<1x64x4xbf16>
    %58 = vector.shape_cast %57 : vector<1x64x4xbf16> to vector<64x4xbf16>
    %c0_34 = arith.constant 0 : index
    %c0_35 = arith.constant 0 : index
    %59 = vector.load %arg5[%c0_34, %c0_35] : memref<4x8xbf16, #tpu.memory_space<vmem>>, vector<4x8xbf16>
    %cst_36 = arith.constant dense<0.000000e+00> : vector<64x8xf32>
    %60 = tpu.matmul %58, %59, %cst_36 {dimension_numbers = #tpu.dot_dimension_numbers<[1], [0], [0], [1], [0, 0, 1, 1], [], []>} : vector<64x4xbf16>, vector<4x8xbf16>, vector<64x8xf32> -> vector<64x8xf32>
    %61 = arith.addf %56, %60 : vector<64x8xf32>
    %c0_37 = arith.constant 0 : index
    %c0_38 = arith.constant 0 : index
    %62 = vector.load %arg3[%c0_37, %c0_38] : memref<1x8xf32, #tpu.memory_space<vmem>>, vector<1x8xf32>
    %63 = vector.broadcast %62 : vector<1x8xf32> to vector<64x8xf32>
    %64 = arith.addf %61, %63 : vector<64x8xf32>
    %c0_39 = arith.constant 0 : index
    %c0_40 = arith.constant 0 : index
    %c0_41 = arith.constant 0 : index
    %65 = vector.load %arg7[%c0_39, %c0_40, %c0_41] : memref<1x64x8xf32, #tpu.memory_space<vmem>>, vector<1x64x8xf32>
    %66 = vector.shape_cast %65 : vector<1x64x8xf32> to vector<64x8xf32>
    %67 = vector.shape_cast %64 : vector<64x8xf32> to vector<1x64x8xf32>
    tpu.vector_store %arg7[%c0_39, %c0_40, %c0_41], %67 {strides = array<i32>} : memref<1x64x8xf32, #tpu.memory_space<vmem>>, vector<1x64x8xf32>,
    %cst_42 = arith.constant 0.000000e+00 : f32
    %68 = vector.broadcast %cst_42 : f32 to vector<64x8xf32>
    %69 = arith.maximumf %64, %68 : vector<64x8xf32>
    %70 = arith.truncf %69 : vector<64x8xf32> to vector<64x8xbf16>
    %c0_43 = arith.constant 0 : index
    %c0_44 = arith.constant 0 : index
    %c0_45 = arith.constant 0 : index
    %71 = vector.load %arg6[%c0_43, %c0_44, %c0_45] : memref<1x64x8xbf16, #tpu.memory_space<vmem>>, vector<1x64x8xbf16>
    %72 = vector.shape_cast %71 : vector<1x64x8xbf16> to vector<64x8xbf16>
    %73 = vector.shape_cast %70 : vector<64x8xbf16> to vector<1x64x8xbf16>
    tpu.vector_store %arg6[%c0_43, %c0_44, %c0_45], %73 {strides = array<i32>} : memref<1x64x8xbf16, #tpu.memory_space<vmem>>, vector<1x64x8xbf16>,
    return
  }
  func.func @transform_0(%arg0: i32) -> (i32, i32, i32, i32) {
    %c0_i32 = arith.constant 0 : i32
    %c0_i32_0 = arith.constant 0 : i32
    %c0_i32_1 = arith.constant 0 : i32
    %c0_i32_2 = arith.constant 0 : i32
    return %arg0, %c0_i32, %c0_i32_0, %c0_i32_1 : i32, i32, i32, i32
  }
  func.func @transform_1(%arg0: i32) -> (i32, i32, i32) {
    %c0_i32 = arith.constant 0 : i32
    %c0_i32_0 = arith.constant 0 : i32
    %c0_i32_1 = arith.constant 0 : i32
    %c0_i32_2 = arith.constant 0 : i32
    return %c0_i32, %c0_i32_0, %c0_i32_1 : i32, i32, i32
  }
  func.func @transform_2(%arg0: i32) -> (i32, i32) {
    %c0_i32 = arith.constant 0 : i32
    %c0_i32_0 = arith.constant 0 : i32
    %c0_i32_1 = arith.constant 0 : i32
    return %c0_i32, %c0_i32_0 : i32, i32
  }
  func.func @transform_3(%arg0: i32) -> (i32, i32, i32) {
    %c0_i32 = arith.constant 0 : i32
    %c0_i32_0 = arith.constant 0 : i32
    %c0_i32_1 = arith.constant 0 : i32
    return %arg0, %c0_i32, %c0_i32_0 : i32, i32, i32
  }
  func.func @transform_4(%arg0: i32) -> (i32, i32) {
    %c0_i32 = arith.constant 0 : i32
    %c0_i32_0 = arith.constant 0 : i32
    %c0_i32_1 = arith.constant 0 : i32
    return %c0_i32, %c0_i32_0 : i32, i32
  }
  func.func @transform_5(%arg0: i32) -> (i32, i32, i32) {
    %c0_i32 = arith.constant 0 : i32
    %c0_i32_0 = arith.constant 0 : i32
    %c0_i32_1 = arith.constant 0 : i32
    return %arg0, %c0_i32, %c0_i32_0 : i32, i32, i32
  }
  func.func @transform_6(%arg0: i32) -> (i32, i32, i32) {
    %c0_i32 = arith.constant 0 : i32
    %c0_i32_0 = arith.constant 0 : i32
    %c0_i32_1 = arith.constant 0 : i32
    return %arg0, %c0_i32, %c0_i32_0 : i32, i32, i32
  }
}

</mosaic_0001>

<bundles_post_ra>
// kernel: basic_block_forward.3
= control target key start
LH: loop header
LB: loop body
LE: loop exit
PB: predicated region body
PF: predicated region fallthrough
CT: control target
= control target key end

     0   :  { %s1391_s21 = smov 0   ;;  %s1859_s0 = inlined_call_operand.vmem [shape: bf16[2,10,10,8], index: 0, kind: input, shape index: {}]   ;;  %s1860_s1 = inlined_call_operand.vmem [shape: bf16[9,8,8], index: 1, kind: input, shape index: {}]   ;;  %s1861_s2 = inlined_call_operand.vmem [shape: f32[1,8], index: 2, kind: input, shape index: {}]   ;;  %s1862_s3 = inlined_call_operand.vmem [shape: bf16[2,64,4], index: 3, kind: input, shape index: {}]   ;;  %s1863_s4 = inlined_call_operand.vmem [shape: bf16[4,8], index: 4, kind: input, shape index: {}]   ;;  %s1864_s5 = inlined_call_operand.vmem [shape: bf16[2,64,8], index: 5, kind: output, shape index: {0}]   ;;  %s1865_s6 = inlined_call_operand.vmem [shape: f32[2,64,8], index: 6, kind: output, shape index: {1}]  }
   0x1 LB: > { %s1241_s22 = sadd.s32 4294967295, %s1354_s21   ;;  %p1245_p0 = scmp.ge.s32.totalorder %s1354_s21, 1  ;;  %s1354_s21 = sphi %s1391_s21, %s17_s21  }
   0x2   : > { %p225_p1 = scmp.lt.s32.totalorder %s1354_s21, 3 }
   0x4   : > { %p226_p2 = pnand %p1245_p0, %p225_p1 }
   0x5   : > { %p265_p3 = scmp.lt.s32.totalorder (!%p226_p2), %s1241_s22, 1 }
   0x6   : > { %229 = sbr.rel (%p226_p2) target bundleno = 330 (0x14a), region = 40 }
   0xb   : > { %v306_v0 = vld [vmem:[%s1860_s1] sm:$0xf]  ;;  %vm449_vm0 = vcmask 1043456   ;;  %v1253_v2 = vld [vmem:[%s1860_s1 + $0x4] sm:$0xf]  ;;  %s1871_s22 = smov (!%p265_p3, %s1241_s22), 1 }
   0xc   : > { %v515_v1 = vsel %vm449_vm0, %v306_v0, 0  ;;  %v451_v3 = vsel %vm449_vm0, %v1253_v2, 0  ;;  %v1270_v4 = vld [vmem:[%s1860_s1 + $0x8] sm:$0xf]  ;;  %v1275_v6 = vld [vmem:[%s1860_s1 + $0xc] sm:$0xf] }
   0xd   : > { %1337 = vmatpush.bf16.msra.mxu3 %v515_v1  ;;  %524 = vmatpush.bf16.msra.mxu1 %v515_v1  ;;  %v616_v5 = vsel %vm449_vm0, %v1270_v4, 0  ;;  %v1280_v7 = vld [vmem:[%s1860_s1 + $0x10] sm:$0xf]  ;;  %s1338_s9 = smul.u32 80, %s1871_s22  ;;  %v676_v8 = vsel %vm449_vm0, %v1275_v6, 0  ;;  %vm436_vm1 = vcmask 64512  }
   0xe   : > { %1336 = vmatpush.bf16.msra.mxu2 %v451_v3  ;;  %460 = vmatpush.bf16.msra.mxu0 %v451_v3  ;;  %v749_v9 = vsel %vm449_vm0, %v1280_v7, 0  ;;  %v1286_v10 = vld [vmem:[%s1860_s1 + $0x14] sm:$0xf]  ;;  %vm307_vm2 = vsmask.f32 3328  ;;  %vm1055_vm5 = vcmask 1041408  }
   0xf   : > { %v813_v11 = vsel %vm449_vm0, %v1286_v10, 0  ;;  %s1429_s14 = scalar_lea.vmem %s1859_s0, %s1338_s9  ;;  %vm308_vm3 = vsmask.f32 7440  ;;  %vm554_vm6 = vcmask 1042432   ;;  %vm555_vm7 = vcmask 1046532   ;;  %s1329_s25 = sshll.u32 %s1871_s22, 5 }
  0x10   : > { %v1432_v12 = vld [vmem:[%s1429_s14 + $0x20] sm:$0xf]  ;;  %v1435_v13 = vld [vmem:[%s1429_s14 + $0x28] sm:$0xf]  ;;  %v1438_v14 = vld [vmem:[%s1429_s14 + $0x24] sm:$0x1]  ;;  %s1693_s28 = scalar_lea.vmem %s1862_s3, %s1329_s25  ;;  %s1795_s13 = scalar_lea.vmem %s1864_s5, %s1329_s25 }
  0x11   : > { %685 = vmatpush.bf16.msrb.mxu3 %v676_v8  ;;  %822 = vmatpush.bf16.msrb.mxu1 %v813_v11  ;;  %v494_v15 = vunpack.c.l.b16 %v1432_v12  ;;  %v495_v16 = vunpack.c.l.b16 %v1435_v13  ;;  %v1443_v17 = vld [vmem:[%s1429_s14 + $0x2c] sm:$0x1]  ;;  %v367_v18 = vshrl.u32 %v1432_v12, 16  ;;  %v370_v19 = vshll.u32 %v1432_v12, 16  ;;  %v1448_v20 = vld [vmem:[%s1429_s14] sm:$0xf]  ;;  %vm1476_vm4 = vmor %vm307_vm2, %vm308_vm3 }
  0x12   : > { %625 = vmatpush.bf16.msrb.mxu2 %v616_v5  ;;  %758 = vmatpush.bf16.msrb.mxu0 %v749_v9  ;;  %v376_v21 = vshll.u32 %v1438_v14, 16  ;;  %v381_v22 = vshrl.u32 %v1435_v13, 16  ;;  %v384_v23 = vshll.u32 %v1435_v13, 16  ;;  %v390_v24 = vshll.u32 %v1443_v17, 16  ;;  %v1455_v25 = vld [vmem:[%s1429_s14 + $0x4] sm:$0x1]  ;;  %vm1605_vm8 = vmor %vm554_vm6, %vm555_vm7 }
  0x13   : > { %v1461_v26 = vpack.c.b16 %v495_v16, %v494_v15  ;;  %v369_v27 = vrot.slane %v367_v18, 4  ;;  %v372_v28 = vrot.slane %v370_v19, 5  ;;  %v1464_v29 = vld [vmem:[%s1429_s14 + $0x8] sm:$0xf]  ;;  %v1467_v30 = vld [vmem:[%s1429_s14 + $0xc] sm:$0x1]  ;;  %v490_v50 = vunpack.c.l.b16 %v1448_v20 }
  0x14   : > { %v378_v31 = vrot.slane %v376_v21, 5  ;;  %v383_v32 = vrot.slane %v381_v22, 4  ;;  %v386_v33 = vrot.slane %v384_v23, 5  ;;  %v392_v34 = vrot.slane %v390_v24, 5  ;;  %v1487_v55 = vld [vmem:[%s1429_s14 + $0x30] sm:$0xf] }
  0x15   : > { %1260 = vmatmul.msk.bf16.vlgmr.msra.gmra.mxu3 %vm436_vm1, %v1461_v26  ;;  %v373_v35 = vor.u32 %v372_v28, %v369_v27  ;;  %v311_v36 = vshrl.u32 %v1448_v20, 16  ;;  %v314_v37 = vshll.u32 %v1448_v20, 16  ;;  %v320_v38 = vshll.u32 %v1455_v25, 16  ;;  %v1495_v60 = vld [vmem:[%s1429_s14 + $0x38] sm:$0xf]  ;;  %s1331_s29 = sshll.u32 %s1871_s22, 6 }
  0x16   : > { %v387_v40 = vor.u32 %v386_v33, %v383_v32  ;;  %v325_v41 = vshrl.u32 %v1464_v29, 16  ;;  %v328_v42 = vshll.u32 %v1464_v29, 16  ;;  %v334_v43 = vshll.u32 %v1467_v30, 16  ;;  %v1498_v61 = vld [vmem:[%s1429_s14 + $0x34] sm:$0x1]  ;;  %s1785_s10 = scalar_lea.vmem %s1865_s6, %s1331_s29 }
  0x17   : > { %v374_v44 = vrot.slane %v373_v35, 4  ;;  %v313_v45 = vrot.slane %v311_v36, 4  ;;  %v316_v46 = vrot.slane %v314_v37, 5  ;;  %v322_v53 = vrot.slane %v320_v38, 5  ;;  %v1521_v9 = vld [vmem:[%s1429_s14 + $0x3c] sm:$0x1] }
  0x18   : > { %v388_v47 = vrot.slane %v387_v40, 4  ;;  %v327_v48 = vrot.slane %v325_v41, 4  ;;  %v330_v49 = vrot.slane %v328_v42, 5  ;;  %v336_v54 = vrot.slane %v334_v43, 5  ;;  %v1525_v11 = vld [vmem:[%s1429_s14 + $0x10] sm:$0xf] }
  0x19   : > { %v379_v51 = vsel %vm1476_vm4, %v374_v44, %v378_v31  ;;  %v317_v52 = vor.u32 %v316_v46, %v313_v45  ;;  %v491_v59 = vunpack.c.l.b16 %v1464_v29  ;;  %v496_v0 = vunpack.c.l.b16 %v1487_v55  ;;  %v1531_v23 = vld [vmem:[%s1429_s14 + $0x14] sm:$0x1]  ;;  %v1547_v41 = vld [vmem:[%s1429_s14 + $0x1c] sm:$0x1] }
  0x1a   : > { %v393_v56 = vsel %vm1476_vm4, %v388_v47, %v392_v34  ;;  %v1491_v57 = vunpack.c.l.b16 %v379_v51  ;;  %v331_v58 = vor.u32 %v330_v49, %v327_v48  ;;  %v497_v1 = vunpack.c.l.b16 %v1495_v60  ;;  %v1541_v34 = vld [vmem:[%s1429_s14 + $0x18] sm:$0xf] }
  0x1b   : > { %v1500_v62 = vunpack.c.l.b16 %v393_v56  ;;  %v318_v63 = vrot.slane %v317_v52, 4  ;;  %v498_v3 = vpack.c.b16 %v491_v59, %v490_v50  ;;  %v395_v4 = vshrl.u32 %v1487_v55, 16 }
  0x1c   : > { %v332_v2 = vrot.slane %v331_v58, 4  ;;  %v398_v5 = vshll.u32 %v1487_v55, 16  ;;  %v1518_v8 = vpack.c.b16 %v497_v1, %v496_v0  ;;  %v404_v10 = vshll.u32 %v1498_v61, 16 }
  0x1d   : > { %v1510_v6 = vpack.c.b16 %v1500_v62, %v1491_v57  ;;  %v323_v7 = vsel %vm1476_vm4, %v318_v63, %v322_v53  ;;  %1258 = vmatmul.msk.bf16.vlgmr.msra.gmra.mxu1 %vm436_vm1, %v498_v3  ;;  %v397_v21 = vrot.slane %v395_v4, 4  ;;  %v409_v28 = vshrl.u32 %v1495_v60, 16 }
  0x1e   : > { %v337_v18 = vsel %vm1476_vm4, %v332_v2, %v336_v54  ;;  %v424_v19 = vunpack.c.l.b16 %v323_v7  ;;  %v400_v22 = vrot.slane %v398_v5, 5  ;;  %v406_v27 = vrot.slane %v404_v10, 5 }
  0x1f   : > { %1256 = vmatmul.msk.bf16.vlgmr.msra.gmra.mxu2 %vm436_vm1, %v1510_v6  ;;  %v1535_v24 = vunpack.c.l.b16 %v337_v18  ;;  %v412_v31 = vshll.u32 %v1495_v60, 16  ;;  %v418_v33 = vshll.u32 %v1521_v9, 16  ;;  %v339_v35 = vshrl.u32 %v1525_v11, 16  ;;  %v1291_v18 = vld [vmem:[%s1860_s1 + $0x18] sm:$0xf] }
  0x20   : > { %v401_v32 = vor.u32 %v400_v22, %v397_v21  ;;  %v342_v36 = vshll.u32 %v1525_v11, 16  ;;  %v411_v38 = vrot.slane %v409_v28, 4  ;;  %v348_v42 = vshll.u32 %v1531_v23, 16 }
  0x21   : > { %v432_v37 = vpack.c.b16 %v1535_v24, %v424_v19  ;;  %v414_v40 = vrot.slane %v412_v31, 5  ;;  %v341_v44 = vrot.slane %v339_v35, 4  ;;  %v420_v47 = vrot.slane %v418_v33, 5  ;;  %v1296_v19 = vld [vmem:[%s1860_s1 + $0x1c] sm:$0xf] }
  0x22   : > { %v402_v43 = vrot.slane %v401_v32, 4  ;;  %v344_v45 = vrot.slane %v342_v36, 5  ;;  %v353_v48 = vshrl.u32 %v1541_v34, 16  ;;  %v356_v49 = vshll.u32 %v1541_v34, 16  ;;  %v1302_v33 = vld [vmem:[%s1860_s1 + $0x20] sm:$0xf] }
  0x23   : > { %1254 = vmatmul.msk.bf16.vlgmr.msra.gmra.mxu0 %vm436_vm1, %v432_v37  ;;  %v415_v46 = vor.u32 %v414_v40, %v411_v38  ;;  %v350_v52 = vrot.slane %v348_v42, 5  ;;  %v362_v53 = vshll.u32 %v1547_v41, 16  ;;  %v492_v2 = vunpack.c.l.b16 %v1525_v11  ;;  %v1021_v38 = vld [vmem:[%s1863_s4] sm:$0x3] }
  0x24   : > { %v407_v50 = vsel %vm1476_vm4, %v402_v43, %v406_v27  ;;  %v345_v51 = vor.u32 %v344_v45, %v341_v44  ;;  %v355_v56 = vrot.slane %v353_v48, 4  ;;  %v358_v58 = vrot.slane %v356_v49, 5 }
  0x25   : > { %1261 = vmatmul.msk.bf16.gmra.mxu3 %vm436_vm1, %v1518_v8  ;;  %v416_v54 = vrot.slane %v415_v46, 4  ;;  %v493_v3 = vunpack.c.l.b16 %v1541_v34  ;;  %v1562_v5 = vunpack.c.l.b16 %v407_v50  ;;  %v364_v10 = vrot.slane %v362_v53, 5 }
  0x26   : > { %v346_v63 = vrot.slane %v345_v51, 4  ;;  %v359_v7 = vor.u32 %v358_v58, %v355_v56  ;;  %v861_v31 = vsel %vm449_vm0, %v1291_v18, 0  ;;  %v922_v32 = vsel %vm449_vm0, %v1296_v19, 0 }
  0x27   : > { %v421_v4 = vsel %vm1476_vm4, %v416_v54, %v420_v47  ;;  %v1574_v28 = vpack.c.b16 %v493_v3, %v492_v2  ;;  %870 = vmatpush.bf16.msra.mxu2 %v861_v31  ;;  %931 = vmatpush.bf16.msra.mxu3 %v922_v32  ;;  %v974_v42 = vsel %vm449_vm0, %v1302_v33, 0  ;;  %v1057_v43 = vsel %vm1055_vm5, %v1021_v38, 0  ;;  %v1655_v33 = vld [vmem:[%s1429_s14 + $0x40] sm:$0xf] }
  0x28   : > { %v1570_v21 = vunpack.c.l.b16 %v421_v4  ;;  %v351_v22 = vsel %vm1476_vm4, %v346_v63, %v350_v52  ;;  %v360_v27 = vrot.slane %v359_v7, 4  ;;  %983 = vmatpush.bf16.msra.mxu0 %v974_v42  ;;  %v567_v45 = vrot.slane %v1531_v23, 5  ;;  %1066 = vmatpush.bf16.msra.mxu1 %v1057_v43 }
  0x29   : > { %v426_v37 = vunpack.c.l.b16 %v351_v22  ;;  %v1264_v46 = vrot.slane %v1525_v11, 9  ;;  %v559_v47 = vrot.slane %v1455_v25, 5  ;;  %v563_v48 = vrot.slane %v1467_v30, 5 }
  0x2a   : > { %v1583_v35 = vpack.c.b16 %v1570_v21, %v1562_v5  ;;  %v365_v36 = vsel %vm1476_vm4, %v360_v27, %v364_v10  ;;  %v1262_v49 = vrot.slane %v1448_v20, 9  ;;  %v1263_v50 = vrot.slane %v1464_v29, 9 }
  0x2b   : > { %v427_v40 = vunpack.c.l.b16 %v365_v36  ;;  %v659_v51 = vpack.c.b16 %v492_v2, %v491_v59  ;;  %v568_v11 = vsel %vm1605_vm8, %v1264_v46, %v567_v45  ;;  %v1267_v29 = vrot.slane %v1435_v13, 9 }
  0x2c   : > { %v560_v25 = vsel %vm1605_vm8, %v1262_v49, %v559_v47  ;;  %v564_v20 = vsel %vm1605_vm8, %v1263_v50, %v563_v48  ;;  %v579_v30 = vrot.slane %v1443_v17, 5  ;;  %v593_v59 = vunpack.c.l.b16 %v568_v11 }
  0x2d   : > { %1259 = vmatmul.msk.bf16.gmra.mxu1 %vm436_vm1, %v1574_v28  ;;  %v1595_v44 = vpack.c.b16 %v427_v40, %v426_v37  ;;  %v591_v23 = vunpack.c.l.b16 %v560_v25  ;;  %v592_v53 = vunpack.c.l.b16 %v564_v20  ;;  %v732_v63 = vpack.c.b16 %v426_v37, %v1535_v24 }
  0x2e   : > { %v580_v54 = vsel %vm1605_vm8, %v1267_v29, %v579_v30  ;;  %v1266_v2 = vrot.slane %v1432_v12, 9  ;;  %v575_v4 = vrot.slane %v1438_v14, 5  ;;  %v1265_v17 = vrot.slane %v1541_v34, 9  ;;  %v1332_v29 = vld [vmem:[%s1693_s28] sm:$0xff] }
  0x2f   : > { %1257 = vmatmul.msk.bf16.gmra.mxu2 %vm436_vm1, %v1583_v35  ;;  %v796_v56 = vpack.c.b16 %v593_v59, %v592_v53  ;;  %v599_v58 = vpack.c.b16 %v592_v53, %v591_v23  ;;  %v571_v7 = vrot.slane %v1547_v41, 5  ;;  %v660_v10 = vpack.c.b16 %v494_v15, %v493_v3 }
  0x30   : > { %v576_v18 = vsel %vm1605_vm8, %v1266_v2, %v575_v4  ;;  %v1269_v24 = vrot.slane %v1495_v60, 9  ;;  %v587_v14 = vrot.slane %v1521_v9, 5  ;;  %v733_v22 = vpack.c.b16 %v1491_v57, %v427_v40  ;;  %v1334_v2 = vld [vmem:[%s1693_s28 + $0x10] sm:$0xff] }
  0x31   : > { %v572_v19 = vsel %vm1605_vm8, %v1265_v17, %v571_v7  ;;  %v595_v34 = vunpack.c.l.b16 %v576_v18  ;;  %v1268_v27 = vrot.slane %v1487_v55, 9  ;;  %v583_v31 = vrot.slane %v1498_v61, 5 }
  0x32   : > { %v594_v41 = vunpack.c.l.b16 %v572_v19  ;;  %v588_v12 = vsel %vm1605_vm8, %v1269_v24, %v587_v14  ;;  %v661_v9 = vpack.c.b16 %v496_v0, %v495_v16  ;;  %v596_v36 = vunpack.c.l.b16 %v580_v54  ;;  %v303_v0 = vld [vmem:[%s1429_s14 + $0x44] sm:$0x1]  ;;  %v305_v54 = vld [vmem:[%s1429_s14 + $0x4c] sm:$0x1] }
  0x33   : > { %1255 = vmatmul.msk.bf16.gmra.mxu0 %vm436_vm1, %v1595_v44  ;;  %v584_v32 = vsel %vm1605_vm8, %v1268_v27, %v583_v31  ;;  %v716_v37 = vshrl.u32 %v1655_v33, 16  ;;  %v719_v61 = vshll.u32 %v1655_v33, 16  ;;  %v658_v16 = vunpack.c.l.b16 %v1655_v33  ;;  %v1335_v27 = vld [vmem:[%s1693_s28 + $0x18] sm:$0xff] }
  0x34   : > { %v797_v15 = vpack.c.b16 %v595_v34, %v594_v41  ;;  %v600_v3 = vpack.c.b16 %v594_v41, %v593_v59  ;;  %v597_v57 = vunpack.c.l.b16 %v584_v32  ;;  %v601_v13 = vpack.c.b16 %v596_v36, %v595_v34 }
  0x35   : > { %1276 = vmatmul.msk.bf16.vlgmr.msrb.gmra.mxu3 %vm436_vm1, %v659_v51  ;;  %v718_v40 = vrot.slane %v716_v37, 4  ;;  %v721_v55 = vrot.slane %v719_v61, 5  ;;  %v734_v42 = vpack.c.b16 %v1562_v5, %v1500_v62  ;;  %v1285_v43 = vrot.slane %v1655_v33, 9 }
  0x36   : > { %v798_v38 = vpack.c.b16 %v597_v57, %v596_v36  ;;  %v791_v45 = vrot.slane %v303_v0, 5  ;;  %v725_v47 = vshll.u32 %v303_v0, 16  ;;  %v662_v48 = vpack.c.b16 %v658_v16, %v497_v1 }
  0x37   : > { %v722_v46 = vor.u32 %v721_v55, %v718_v40  ;;  %v598_v51 = vunpack.c.l.b16 %v588_v12  ;;  %vm1042_vm9 = vcmask 31744   ;;  %v964_v34 = vrot.slane %v305_v54, 5 }
  0x38   : > { %v1673_v49 = vsel %vm1605_vm8, %v1285_v43, %v791_v45  ;;  %v727_v62 = vrot.slane %v725_v47, 5  ;;  %vm1132_vm10 = vcmask 60416  }
  0x39   : > { %v723_v50 = vrot.slane %v722_v46, 4  ;;  %v795_v5 = vunpack.c.l.b16 %v1673_v49  ;;  %v602_v11 = vpack.c.b16 %v598_v51, %v597_v57 }
  0x3b   : > { %v728_v60 = vsel %vm1476_vm4, %v723_v50, %v727_v62  ;;  %v799_v1 = vpack.c.b16 %v795_v5, %v598_v51 }
  0x3c   : > { %v731_v25 = vunpack.c.l.b16 %v728_v60 }
  0x3d   : > { %1287 = vmatmul.msk.bf16.vlgmr.msrb.gmra.mxu1 %vm436_vm1, %v796_v56 }
  0x3e   : > { %v735_v20 = vpack.c.b16 %v731_v25, %v1570_v21  ;;  %v304_v21 = vld [vmem:[%s1429_s14 + $0x48] sm:$0xf] }
  0x3f   : > { %1271 = vmatmul.msk.bf16.vlgmr.msrb.gmra.mxu2 %vm436_vm1, %v599_v58  ;;  %v901_v30 = vshrl.u32 %v304_v21, 16  ;;  %v904_v59 = vshll.u32 %v304_v21, 16  ;;  %v1301_v14 = vrot.slane %v304_v21, 9  ;;  %v855_v41 = vunpack.c.l.b16 %v304_v21 }
  0x41   : > { %v903_v23 = vrot.slane %v901_v30, 4  ;;  %v906_v53 = vrot.slane %v904_v59, 5  ;;  %v856_v32 = vpack.c.b16 %v855_v41, %v658_v16 }
  0x43   : > { %1281 = vmatmul.msk.bf16.vlgmr.msrb.gmra.mxu0 %vm436_vm1, %v732_v63  ;;  %v907_v56 = vor.u32 %v906_v53, %v903_v23 }
  0x45   : > { %1277 = vmatmul.msk.bf16.gmra.mxu3 %vm436_vm1, %v660_v10 }
  0x4d   : > { %1288 = vmatmul.msk.bf16.gmra.mxu1 %vm436_vm1, %v797_v15 }
  0x4f   : > { %1272 = vmatmul.msk.bf16.gmra.mxu2 %vm436_vm1, %v600_v3 }
  0x53   : > { %1282 = vmatmul.msk.bf16.gmra.mxu0 %vm436_vm1, %v733_v22 }
  0x55   : > { %1278 = vmatmul.msk.bf16.gmra.mxu3 %vm436_vm1, %v661_v9 }
  0x5d   : > { %1289 = vmatmul.msk.bf16.gmra.mxu1 %vm436_vm1, %v798_v38 }
  0x5f   : > { %1273 = vmatmul.msk.bf16.gmra.mxu2 %vm436_vm1, %v601_v13 }
  0x63   : > { %1283 = vmatmul.msk.bf16.gmra.mxu0 %vm436_vm1, %v734_v42 }
  0x65   : > { %1279 = vmatmul.msk.bf16.gmra.mxu3 %vm436_vm1, %v662_v48 }
  0x6d   : > { %1290 = vmatmul.msk.bf16.gmra.mxu1 %vm436_vm1, %v799_v1 }
  0x6f   : > { %1274 = vmatmul.msk.bf16.gmra.mxu2 %vm436_vm1, %v602_v11 }
  0x73   : > { %1284 = vmatmul.msk.bf16.gmra.mxu0 %vm436_vm1, %v735_v20 }
  0x75   : > { %1297 = vmatmul.msk.bf16.vlgmr.msra.gmra.mxu3 %vm436_vm1, %v1595_v44  ;;  %v1333_v44 = vld [vmem:[%s1693_s28 + $0x8] sm:$0xff] }
  0x7d   : > { %1323 = vmatmul.msk.bf16.vlgmr.msra.gmra.mxu1 %vm1042_vm9, %v1332_v29 }
  0x7f   : > { %1292 = vmatmul.msk.bf16.vlgmr.msra.gmra.mxu2 %vm436_vm1, %v1574_v28  ;;  %v910_v28 = vshll.u32 %v305_v54, 16 }
  0x81   : > { %v912_v58 = vrot.slane %v910_v28, 5 }
  0x83   : > { %1303 = vmatmul.msk.bf16.vlgmr.msra.gmra.mxu0 %vm436_vm1, %v600_v3 }
  0x85   : > { %1298 = vmatmul.msk.bf16.gmra.mxu3 %vm436_vm1, %v1510_v6  ;;  %v908_v6 = vrot.slane %v907_v56, 4 }
  0x87   : > { %v913_v4 = vsel %vm1476_vm4, %v908_v6, %v912_v58 }
  0x88   : > { %v916_v7 = vunpack.c.l.b16 %v913_v4 }
  0x8d   : > { %1324 = vmatmul.msk.bf16.gmra.mxu1 %vm1042_vm9, %v1333_v44 }
  0x8f   : > { %1293 = vmatmul.msk.bf16.gmra.mxu2 %vm436_vm1, %v1461_v26 }
  0x93   : > { %1304 = vmatmul.msk.bf16.gmra.mxu0 %vm436_vm1, %v601_v13 }
  0x95   : > { %1299 = vmatmul.msk.bf16.gmra.mxu3 %vm436_vm1, %v1583_v35  ;;  %v917_v35 = vpack.c.b16 %v916_v7, %v731_v25 }
  0x98   : > { %v536_v63 = vpop.f32.mrf.mxu3 }
  0x9a   : > { %v526_v17 = vpop.f32.mrf.mxu1 }
  0x9d   : > { %1325 = vmatmul.msk.bf16.gmra.mxu1 %vm1042_vm9, %v1334_v2 }
  0x9f   : > { %1294 = vmatmul.msk.bf16.gmra.mxu2 %vm436_vm1, %v1518_v8  ;;  %v965_v8 = vsel %vm1605_vm8, %v1301_v14, %v964_v34 }
  0xa0   : > { %v462_v26 = vpop.f32.mrf.mxu0  ;;  %v538_v10 = vpop.f32.mrf.mxu3  ;;  %v968_v57 = vunpack.c.l.b16 %v965_v8 }
  0xa1   : > { %v1717_v18 = vadd.f32 %v526_v17, %v462_v26 }
  0xa2   : > { %v472_v19 = vpop.f32.mrf.mxu2  ;;  %v528_v39 = vpop.f32.mrf.mxu1  ;;  %v969_v36 = vpack.c.b16 %v968_v57, %v795_v5  ;;  %v1780_v57 = vld [vmem:[%s1861_s2] ss:$0 sm:$0xff] }
  0xa3   : > { %1305 = vmatmul.msk.bf16.gmra.mxu0 %vm436_vm1, %v602_v11  ;;  %v1720_v24 = vadd.f32 %v536_v63, %v472_v19 }
  0xa5   : > { %1300 = vmatmul.msk.bf16.gmra.mxu3 %vm436_vm1, %v917_v35 }
  0xa8   : > { %v464_v12 = vpop.f32.mrf.mxu0  ;;  %v541_v15 = vpop.f32.mrf.mxu3 }
  0xa9   : > { %v529_v3 = vadd.f32 %v528_v39, %v464_v12 }
  0xaa   : > { %v474_v22 = vpop.f32.mrf.mxu2  ;;  %v531_v9 = vpop.f32.mrf.mxu1 }
  0xab   : > { %v1726_v31 = vadd.f32 %v538_v10, %v474_v22 }
  0xad   : > { %1326 = vmatmul.msk.bf16.gmra.mxu1 %vm1042_vm9, %v1335_v27 }
  0xaf   : > { %1295 = vmatmul.msk.bf16.gmra.mxu2 %vm436_vm1, %v856_v32 }
  0xb0   : > { %v467_v37 = vpop.f32.mrf.mxu0  ;;  %v543_v52 = vpop.f32.mrf.mxu3 }
  0xb1   : > { %v532_v61 = vadd.f32 %v531_v9, %v467_v37 }
  0xb2   : > { %v477_v38 = vpop.f32.mrf.mxu2  ;;  %v533_v40 = vpop.f32.mrf.mxu1 }
  0xb3   : > { %1306 = vmatmul.msk.bf16.gmra.mxu0 %vm436_vm1, %v969_v36  ;;  %v1735_v13 = vadd.f32 %v541_v15, %v477_v38 }
  0xb8   : > { %v469_v55 = vpop.f32.mrf.mxu0  ;;  %v687_v33 = vpop.f32.mrf.mxu3 }
  0xb9   : > { %v534_v16 = vadd.f32 %v533_v40, %v469_v55 }
  0xba   : > { %v479_v0 = vpop.f32.mrf.mxu2  ;;  %v824_v43 = vpop.f32.mrf.mxu1 }
  0xbb   : > { %v1737_v42 = vadd.f32 %v543_v52, %v479_v0 }
  0xc0   : > { %v760_v45 = vpop.f32.mrf.mxu0  ;;  %v689_v46 = vpop.f32.mrf.mxu3 }
  0xc2   : > { %v627_v47 = vpop.f32.mrf.mxu2  ;;  %v826_v48 = vpop.f32.mrf.mxu1 }
  0xc3   : > { %v647_v4 = vadd.f32 %v627_v47, %v1717_v18 }
  0xc5   : > { %v707_v26 = vadd.f32 %v687_v33, %v647_v4 }
  0xc7   : > { %v780_v39 = vadd.f32 %v760_v45, %v707_v26 }
  0xc8   : > { %v762_v49 = vpop.f32.mrf.mxu0  ;;  %v692_v50 = vpop.f32.mrf.mxu3 }
  0xc9   : > { %v844_v12 = vadd.f32 %v824_v43, %v780_v39 }
  0xca   : > { %v629_v62 = vpop.f32.mrf.mxu2  ;;  %v1739_v5 = vpop.f32.mrf.mxu1 }
  0xcb   : > { %v648_v19 = vadd.f32 %v629_v62, %v529_v3 }
  0xcd   : > { %v708_v41 = vadd.f32 %v689_v46, %v648_v19 }
  0xcf   : > { %v781_v18 = vadd.f32 %v762_v49, %v708_v41 }
  0xd0   : > { %v765_v51 = vpop.f32.mrf.mxu0  ;;  %v694_v60 = vpop.f32.mrf.mxu3 }
  0xd1   : > { %v845_v52 = vadd.f32 %v826_v48, %v781_v18 }
  0xd2   : > { %v632_v1 = vpop.f32.mrf.mxu2  ;;  %v1741_v11 = vpop.f32.mrf.mxu1 }
  0xd3   : > { %v649_v27 = vadd.f32 %v632_v1, %v532_v61 }
  0xd5   : > { %v709_v36 = vadd.f32 %v692_v50, %v649_v27 }
  0xd7   : > { %v782_v45 = vadd.f32 %v765_v51, %v709_v36 }
  0xd8   : > { %v1743_v25 = vpop.f32.mrf.mxu0  ;;  %v1745_v20 = vpop.f32.mrf.mxu3 }
  0xd9   : > { %v846_v62 = vadd.f32 %v1739_v5, %v782_v45 }
  0xda   : > { %v634_v29 = vpop.f32.mrf.mxu2  ;;  %v1747_v21 = vpop.f32.mrf.mxu1 }
  0xdb   : > { %v650_v33 = vadd.f32 %v634_v29, %v534_v16 }
  0xdd   : > { %v710_v50 = vadd.f32 %v694_v60, %v650_v33 }
  0xdf   : > { %v783_v60 = vadd.f32 %v1743_v25, %v710_v50 }
  0xe0   : > { %v1749_v44 = vpop.f32.mrf.mxu0  ;;  %v1751_v30 = vpop.f32.mrf.mxu3 }
  0xe2   : > { %v637_v59 = vpop.f32.mrf.mxu2  ;;  %v1753_v23 = vpop.f32.mrf.mxu1 }
  0xe8   : > { %v1755_v53 = vpop.f32.mrf.mxu0  ;;  %v1757_v54 = vpop.f32.mrf.mxu3 }
  0xea   : > { %v1759_v56 = vpop.f32.mrf.mxu2  ;;  %v1761_v28 = vpop.f32.mrf.mxu1 }
  0xf0   : > { %v1763_v6 = vpop.f32.mrf.mxu0  ;;  %v1765_v58 = vpop.f32.mrf.mxu3 }
  0xf2   : > { %v1767_v63 = vpop.f32.mrf.mxu2  ;;  %v1769_v2 = vpop.f32.mrf.mxu1 }
  0xf8   : > { %v1772_v17 = vpop.f32.mrf.mxu0  ;;  %v933_v7 = vpop.f32.mrf.mxu3 }
  0xfa   : > { %v1774_v10 = vpop.f32.mrf.mxu2  ;;  %v1068_v35 = vpop.f32.mrf.mxu1 }
 0x100   : > { %v985_v14 = vpop.f32.mrf.mxu0  ;;  %v935_v34 = vpop.f32.mrf.mxu3 }
 0x102   : > { %v872_v15 = vpop.f32.mrf.mxu2  ;;  %v1070_v22 = vpop.f32.mrf.mxu1 }
 0x103   : > { %v892_v8 = vadd.f32 %v872_v15, %v844_v12  ;;  %v847_v12 = vadd.f32 %v1741_v11, %v783_v60 }
 0x105   : > { %v953_v9 = vadd.f32 %v933_v7, %v892_v8  ;;  %v651_v7 = vadd.f32 %v637_v59, %v1720_v24  ;;  %v652_v8 = vadd.f32 %v1759_v56, %v1726_v31 }
 0x107   : > { %v1005_v32 = vadd.f32 %v985_v14, %v953_v9  ;;  %v711_v5 = vadd.f32 %v1745_v20, %v651_v7  ;;  %v712_v11 = vadd.f32 %v1751_v30, %v652_v8 }
 0x108   : > { %v987_v3 = vpop.f32.mrf.mxu0  ;;  %v938_v38 = vpop.f32.mrf.mxu3 }
 0x109   : > { %v1088_v37 = vadd.f32 %v1068_v35, %v1005_v32  ;;  %v784_v20 = vadd.f32 %v1749_v44, %v711_v5  ;;  %v653_v44 = vadd.f32 %v1767_v63, %v1735_v13  ;;  %v785_v30 = vadd.f32 %v1755_v53, %v712_v11 }
 0x10a   : > { %v874_v61 = vpop.f32.mrf.mxu2  ;;  %v1073_v46 = vpop.f32.mrf.mxu1  ;;  %v654_v53 = vadd.f32 %v1774_v10, %v1737_v42 }
 0x10b   : > { %v1100_v40 = vadd.f32 %v1780_v57, %v1088_v37  ;;  %v893_v55 = vadd.f32 %v874_v61, %v845_v52  ;;  %v848_v36 = vadd.f32 %v1747_v21, %v784_v20  ;;  %v713_v21 = vadd.f32 %v1757_v54, %v653_v44 }
 0x10d   : > { %1108 = vst.msk [vmem:[%s1785_s10] sm:$0xff] %vm436_vm1, %v1100_v40  ;;  %v1116_v0 = vmax.f32 %v1100_v40, 0.0  ;;  %v954_v43 = vadd.f32 %v935_v34, %v893_v55 }
 0x10f   : > { %v1124_v47 = vpack.c.bf16 %v1116_v0, %v1116_v0  ;;  %v1006_v48 = vadd.f32 %v987_v3, %v954_v43  ;;  %v849_v43 = vadd.f32 %v1753_v23, %v785_v30  ;;  %v714_v23 = vadd.f32 %v1765_v58, %v654_v53 }
 0x110   : > { %v990_v49 = vpop.f32.mrf.mxu0  ;;  %v940_v4 = vpop.f32.mrf.mxu3 }
 0x111   : > { %1133 = vst.msk [vmem:[%s1795_s13] sm:$0xf] %vm1132_vm10, %v1124_v47  ;;  %v1089_v16 = vadd.f32 %v1070_v22, %v1006_v48 }
 0x112   : > { %v877_v51 = vpop.f32.mrf.mxu2  ;;  %v1075_v34 = vpop.f32.mrf.mxu1 }
 0x113   : > { %v1101_v1 = vadd.f32 %v1780_v57, %v1089_v16  ;;  %v894_v29 = vadd.f32 %v877_v51, %v846_v62 }
 0x115   : > { %1109 = vst.msk [vmem:[%s1785_s10 + $0x8] sm:$0xff] %vm436_vm1, %v1101_v1  ;;  %v1117_v26 = vmax.f32 %v1101_v1, 0.0  ;;  %v955_v35 = vadd.f32 %v938_v38, %v894_v29 }
 0x117   : > { %v1125_v19 = vpack.c.bf16 %v1117_v26, %v1117_v26  ;;  %v1007_v39 = vadd.f32 %v990_v49, %v955_v35  ;;  %v786_v49 = vadd.f32 %v1763_v6, %v713_v21  ;;  %v787_v26 = vadd.f32 %v1772_v17, %v714_v23 }
 0x118   : > { %v992_v14 = vpop.f32.mrf.mxu0  ;;  %v943_v27 = vpop.f32.mrf.mxu3 }
 0x119   : > { %1134 = vst.msk [vmem:[%s1795_s13 + $0x4] sm:$0xf] %vm1132_vm10, %v1125_v19  ;;  %v1090_v41 = vadd.f32 %v1073_v46, %v1007_v39  ;;  %v850_v51 = vadd.f32 %v1761_v28, %v786_v49  ;;  %v851_v19 = vadd.f32 %v1769_v2, %v787_v26 }
 0x11a   : > { %v879_v24 = vpop.f32.mrf.mxu2  ;;  %v1078_v31 = vpop.f32.mrf.mxu1 }
 0x11b   : > { %v1102_v59 = vadd.f32 %v1780_v57, %v1090_v41  ;;  %v895_v15 = vadd.f32 %v879_v24, %v847_v12 }
 0x11d   : > { %1110 = vst.msk [vmem:[%s1785_s10 + $0x10] sm:$0xff] %vm436_vm1, %v1102_v59  ;;  %v1118_v25 = vmax.f32 %v1102_v59, 0.0  ;;  %v956_v22 = vadd.f32 %v940_v4, %v895_v15 }
 0x11f   : > { %v1126_v9 = vpack.c.bf16 %v1118_v25, %v1118_v25  ;;  %v1008_v18 = vadd.f32 %v992_v14, %v956_v22 }
 0x120   : > { %v995_v32 = vpop.f32.mrf.mxu0  ;;  %v945_v33 = vpop.f32.mrf.mxu3 }
 0x121   : > { %1135 = vst.msk [vmem:[%s1795_s13 + $0x8] sm:$0xf] %vm1132_vm10, %v1126_v9  ;;  %v1091_v3 = vadd.f32 %v1075_v34, %v1008_v18 }
 0x122   : > { %v882_v56 = vpop.f32.mrf.mxu2  ;;  %v1080_v47 = vpop.f32.mrf.mxu1 }
 0x123   : > { %v1103_v37 = vadd.f32 %v1780_v57, %v1091_v3  ;;  %v896_v52 = vadd.f32 %v882_v56, %v848_v36 }
 0x125   : > { %1111 = vst.msk [vmem:[%s1785_s10 + $0x18] sm:$0xff] %vm436_vm1, %v1103_v37  ;;  %v1119_v61 = vmax.f32 %v1103_v37, 0.0  ;;  %v957_v38 = vadd.f32 %v943_v27, %v896_v52 }
 0x127   : > { %v1127_v40 = vpack.c.bf16 %v1119_v61, %v1119_v61  ;;  %v1009_v55 = vadd.f32 %v995_v32, %v957_v38 }
 0x128   : > { %v997_v45 = vpop.f32.mrf.mxu0  ;;  %v948_v1 = vpop.f32.mrf.mxu3 }
 0x129   : > { %1136 = vst.msk [vmem:[%s1795_s13 + $0xc] sm:$0xf] %vm1132_vm10, %v1127_v40  ;;  %v1092_v0 = vadd.f32 %v1078_v31, %v1009_v55 }
 0x12a   : > { %v884_v13 = vpop.f32.mrf.mxu2  ;;  %v1083_v58 = vpop.f32.mrf.mxu1 }
 0x12b   : > { %v1104_v63 = vadd.f32 %v1780_v57, %v1092_v0  ;;  %v897_v46 = vadd.f32 %v884_v13, %v849_v43 }
 0x12d   : > { %1112 = vst.msk [vmem:[%s1785_s10 + $0x20] sm:$0xff] %vm436_vm1, %v1104_v63  ;;  %v1120_v48 = vmax.f32 %v1104_v63, 0.0  ;;  %v958_v54 = vadd.f32 %v945_v33, %v897_v46 }
 0x12f   : > { %v1128_v50 = vpack.c.bf16 %v1120_v48, %v1120_v48  ;;  %v1010_v16 = vadd.f32 %v997_v45, %v958_v54 }
 0x130   : > { %v1000_v4 = vpop.f32.mrf.mxu0  ;;  %v950_v5 = vpop.f32.mrf.mxu3 }
 0x131   : > { %1137 = vst.msk [vmem:[%s1795_s13 + $0x10] sm:$0xf] %vm1132_vm10, %v1128_v50  ;;  %v1093_v62 = vadd.f32 %v1080_v47, %v1010_v16 }
 0x132   : > { %v887_v29 = vpop.f32.mrf.mxu2  ;;  %v1085_v15 = vpop.f32.mrf.mxu1 }
 0x133   : > { %v1105_v42 = vadd.f32 %v1780_v57, %v1093_v62  ;;  %v898_v10 = vadd.f32 %v887_v29, %v850_v51 }
 0x135   : > { %1113 = vst.msk [vmem:[%s1785_s10 + $0x28] sm:$0xff] %vm436_vm1, %v1105_v42  ;;  %v1121_v6 = vmax.f32 %v1105_v42, 0.0  ;;  %v959_v7 = vadd.f32 %v948_v1, %v898_v10 }
 0x137   : > { %v1129_v35 = vpack.c.bf16 %v1121_v6, %v1121_v6  ;;  %v1011_v60 = vadd.f32 %v1000_v4, %v959_v7 }
 0x138   : > { %v1002_v12 = vpop.f32.mrf.mxu0 }
 0x139   : > { %1138 = vst.msk [vmem:[%s1795_s13 + $0x14] sm:$0xf] %vm1132_vm10, %v1129_v35  ;;  %v1094_v28 = vadd.f32 %v1083_v58, %v1011_v60 }
 0x13a   : > { %v889_v39 = vpop.f32.mrf.mxu2 }
 0x13b   : > { %v1106_v14 = vadd.f32 %v1780_v57, %v1094_v28  ;;  %v899_v34 = vadd.f32 %v889_v39, %v851_v19 }
 0x13d   : > { %1114 = vst.msk [vmem:[%s1785_s10 + $0x30] sm:$0xff] %vm436_vm1, %v1106_v14  ;;  %v1122_v41 = vmax.f32 %v1106_v14, 0.0  ;;  %v960_v17 = vadd.f32 %v950_v5, %v899_v34 }
 0x13f   : > { %v1130_v24 = vpack.c.bf16 %v1122_v41, %v1122_v41  ;;  %v1012_v59 = vadd.f32 %v1002_v12, %v960_v17 }
 0x141   : > { %1139 = vst.msk [vmem:[%s1795_s13 + $0x18] sm:$0xf] %vm1132_vm10, %v1130_v24  ;;  %v1095_v8 = vadd.f32 %v1085_v15, %v1012_v59 }
 0x143   : > { %v1107_v25 = vadd.f32 %v1780_v57, %v1095_v8 }
 0x145   : > { %1115 = vst.msk [vmem:[%s1785_s10 + $0x38] sm:$0xff] %vm436_vm1, %v1107_v25  ;;  %v1123_v2 = vmax.f32 %v1107_v25, 0.0 }
 0x147   : > { %v1131_v22 = vpack.c.bf16 %v1123_v2, %v1123_v2 }
 0x149   : > { %1140 = vst.msk [vmem:[%s1795_s13 + $0x1c] sm:$0xf] %vm1132_vm10, %v1131_v22 }
 0x14a PF: > { %s17_s21 = sadd.s32 1, %s1354_s21  }
 0x14b   : > { %p14_p4 = scmp.ge.s32.totalorder %s17_s21, 4  }
 0x14d   :  { %16 = sbr.rel (!%p14_p4) target bundleno = 1 (0x1), region = 93 }

// kernel: basic_block_forward.2
= control target key start
LH: loop header
LB: loop body
LE: loop exit
PB: predicated region body
PF: predicated region fallthrough
CT: control target
= control target key end

     0   :  { %s1531_s21 = smov 0   ;;  %s1934_s0 = inlined_call_operand.vmem [shape: bf16[2,9,9,4], index: 0, kind: input, shape index: {}]   ;;  %s1935_s1 = inlined_call_operand.vmem [shape: bf16[2,9,8,4], index: 1, kind: input, shape index: {}]   ;;  %s1936_s2 = inlined_call_operand.vmem [shape: bf16[2,8,9,4], index: 2, kind: input, shape index: {}]   ;;  %s1937_s3 = inlined_call_operand.vmem [shape: bf16[2,8,8,4], index: 3, kind: input, shape index: {}]   ;;  %s1938_s4 = inlined_call_operand.vmem [shape: bf16[9,4,8], index: 4, kind: input, shape index: {}]   ;;  %s1939_s5 = inlined_call_operand.vmem [shape: f32[1,8], index: 5, kind: input, shape index: {}]   ;;  %s1940_s6 = inlined_call_operand.vmem [shape: bf16[2,64,8], index: 6, kind: output, shape index: {}]  }
   0x1 LB: > { %s1325_s22 = sadd.s32 4294967295, %s1494_s21   ;;  %p1329_p0 = scmp.ge.s32.totalorder %s1494_s21, 1  ;;  %s1494_s21 = sphi %s1531_s21, %s16_s21  }
   0x2   : > { %p242_p1 = scmp.lt.s32.totalorder %s1494_s21, 3 }
   0x4   : > { %p243_p2 = pnand %p1329_p0, %p242_p1 }
   0x5   : > { %p287_p3 = scmp.lt.s32.totalorder (!%p243_p2), %s1325_s22, 1 }
   0x6   : > { %246 = sbr.rel (%p243_p2) target bundleno = 300 (0x12c), region = 44 }
   0xb   : > { %v1338_v0 = vld [vmem:[%s1938_s4 + $0x2] sm:$0x3]  ;;  %vm400_vm0 = vcmask 1041408   ;;  %v1347_v2 = vld [vmem:[%s1938_s4 + $0x4] sm:$0x3]  ;;  %s1944_s22 = smov (!%p287_p3, %s1325_s22), 1 }
   0xc   : > { %v402_v1 = vsel %vm400_vm0, %v1338_v0, 0  ;;  %v1352_v3 = vld [vmem:[%s1938_s4 + $0x6] sm:$0x3]  ;;  %v639_v4 = vsel %vm400_vm0, %v1347_v2, 0  ;;  %v364_v6 = vld [vmem:[%s1938_s4] sm:$0x3] }
   0xd   : > { %1474 = vmatpush.bf16.msra.mxu1 %v402_v1  ;;  %1475 = vmatpush.bf16.msra.mxu2 %v402_v1  ;;  %v713_v5 = vsel %vm400_vm0, %v1352_v3, 0  ;;  %v466_v7 = vsel %vm400_vm0, %v364_v6, 0  ;;  %v1373_v8 = vld [vmem:[%s1938_s4 + $0x8] sm:$0x3]  ;;  %s1477_s9 = smul.u32 72, %s1944_s22  ;;  %vm387_vm1 = vcmask 31744  }
   0xe   : > { %1476 = vmatpush.bf16.msra.mxu3 %v402_v1  ;;  %411 = vmatpush.bf16.msra.mxu0 %v402_v1  ;;  %v787_v9 = vsel %vm400_vm0, %v1373_v8, 0  ;;  %s1478_s10 = smul.u32 36, %s1944_s22  ;;  %v1399_v10 = vld [vmem:[%s1938_s4 + $0xc] sm:$0x3]  ;;  %vm497_vm2 = vsmask.f32 3328 }
   0xf   : > { %s1569_s15 = scalar_lea.vmem %s1934_s0, %s1477_s9  ;;  %vm498_vm3 = vsmask.f32 7440  ;;  %v1404_v11 = vld [vmem:[%s1938_s4 + $0xe] sm:$0x3]  ;;  %v1025_v20 = vsel %vm400_vm0, %v1399_v10, 0  ;;  %s1416_s25 = sshll.u32 %s1944_s22, 6 }
  0x10   : > { %s1577_s20 = scalar_lea.vmem %s1935_s1, %s1478_s10  ;;  %v1580_v12 = vld [vmem:[%s1569_s15] sm:$0xf]  ;;  %v1583_v13 = vld [vmem:[%s1569_s15 + $0x8] sm:$0xf]  ;;  %v314_v14 = vld [vmem:[%s1569_s15 + $0x4] sm:$0x1]  ;;  %s1626_s30 = scalar_lea.vmem %s1936_s2, %s1416_s25 }
  0x11   : > { %648 = vmatpush.bf16.msrb.mxu2 %v639_v4  ;;  %475 = vmatpush.bf16.msrb.mxu1 %v466_v7  ;;  %v1443_v15 = vld [vmem:[%s1577_s20 + $0x8] sm:$0xff]   ;;  %v1444_v16 = vld [vmem:[%s1577_s20 + $0x10] sm:$0xff]   ;;  %v1445_v17 = vld [vmem:[%s1577_s20 + $0x18] sm:$0xff]   ;;  %v501_v18 = vshrl.u32 %v1580_v12, 16  ;;  %v504_v19 = vshll.u32 %v1580_v12, 16  ;;  %v515_v22 = vshrl.u32 %v1583_v13, 16  ;;  %v441_v49 = vunpack.c.l.b16 %v1580_v12 }
  0x12   : > { %722 = vmatpush.bf16.msrb.mxu3 %v713_v5  ;;  %796 = vmatpush.bf16.msrb.mxu0 %v787_v9  ;;  %v1428_v21 = vld [vmem:[%s1577_s20] sm:$0xff]   ;;  %v518_v23 = vshll.u32 %v1583_v13, 16  ;;  %v316_v24 = vld [vmem:[%s1569_s15 + $0xc] sm:$0x1]  ;;  %v510_v25 = vshll.u32 %v314_v14, 16  ;;  %v1085_v32 = vsel %vm400_vm0, %v1404_v11, 0  ;;  %vm1615_vm4 = vmor %vm497_vm2, %vm498_vm3  ;;  %v442_v51 = vunpack.c.l.b16 %v1583_v13 }
  0x13   : > { %1340 = vmatmul.msk.bf16.vlgmr.msra.gmra.mxu1 %vm387_vm1, %v1443_v15  ;;  %1341 = vmatmul.msk.bf16.vlgmr.msra.gmra.mxu2 %vm387_vm1, %v1444_v16  ;;  %v503_v26 = vrot.slane %v501_v18, 4  ;;  %v506_v27 = vrot.slane %v504_v19, 5  ;;  %v524_v28 = vshll.u32 %v316_v24, 16  ;;  %v1394_v29 = vld [vmem:[%s1938_s4 + $0xa] sm:$0x3]  ;;  %v517_v30 = vrot.slane %v515_v22, 4 }
  0x14   : > { %1342 = vmatmul.msk.bf16.vlgmr.msra.gmra.mxu3 %vm387_vm1, %v1445_v17  ;;  %1339 = vmatmul.msk.bf16.vlgmr.msra.gmra.mxu0 %vm387_vm1, %v1428_v21  ;;  %v520_v31 = vrot.slane %v518_v23, 5  ;;  %v1409_v33 = vld [vmem:[%s1938_s4 + $0x10] sm:$0x3]  ;;  %v512_v35 = vrot.slane %v510_v25, 5  ;;  %v965_v36 = vsel %vm400_vm0, %v1394_v29, 0  ;;  %s1417_s7 = sshll.u32 %s1944_s22, 5  ;;  %v449_v63 = vpack.c.b16 %v442_v51, %v441_v49 }
  0x15   : > { %1034 = vmatpush.bf16.msra.mxu2 %v1025_v20  ;;  %v507_v34 = vor.u32 %v506_v27, %v503_v26  ;;  %v1158_v37 = vsel %vm400_vm0, %v1409_v33, 0  ;;  %v1611_v38 = vld [vmem:[%s1569_s15 + $0x10] sm:$0xf]  ;;  %v526_v41 = vrot.slane %v524_v28, 5  ;;  %974 = vmatpush.bf16.msra.mxu1 %v965_v36  ;;  %v1620_v42 = vld [vmem:[%s1569_s15 + $0x18] sm:$0xf]  ;;  %s1647_s10 = scalar_lea.vmem %s1937_s3, %s1417_s7 }
  0x16   : > { %1094 = vmatpush.bf16.msra.mxu3 %v1085_v32  ;;  %v521_v40 = vor.u32 %v520_v31, %v517_v30  ;;  %1167 = vmatpush.bf16.msra.mxu0 %v1158_v37  ;;  %v529_v43 = vshrl.u32 %v1611_v38, 16  ;;  %v532_v45 = vshll.u32 %v1611_v38, 16  ;;  %v543_v46 = vshrl.u32 %v1620_v42, 16  ;;  %v1355_v54 = vld [vmem:[%s1626_s30] sm:$0xf] }
  0x17   : > { %v508_v44 = vrot.slane %v507_v34, 4  ;;  %v546_v47 = vshll.u32 %v1620_v42, 16  ;;  %v1419_v55 = vld [vmem:[%s1626_s30 + $0x4] sm:$0xf0]  ;;  %v318_v61 = vld [vmem:[%s1569_s15 + $0x14] sm:$0x1]  ;;  %v443_v20 = vunpack.c.l.b16 %v1611_v38  ;;  %v444_v21 = vunpack.c.l.b16 %v1620_v42 }
  0x18   : > { %v522_v48 = vrot.slane %v521_v40, 4  ;;  %v531_v56 = vrot.slane %v529_v43, 4  ;;  %v534_v58 = vrot.slane %v532_v45, 5  ;;  %v545_v59 = vrot.slane %v543_v46, 4  ;;  %v320_v62 = vld [vmem:[%s1569_s15 + $0x1c] sm:$0x1] }
  0x19   : > { %v513_v50 = vsel %vm1615_vm4, %v508_v44, %v512_v35  ;;  %v548_v60 = vrot.slane %v546_v47, 5  ;;  %v1356_v1 = vor.u32 %v1419_v55, %v1355_v54  ;;  %v1423_v2 = vld [vmem:[%s1647_s10] sm:$0xff]  ;;  %v538_v4 = vshll.u32 %v318_v61, 16  ;;  %v1663_v12 = vld [vmem:[%s1569_s15 + $0x28] sm:$0xf] }
  0x1a   : > { %v527_v52 = vsel %vm1615_vm4, %v522_v48, %v526_v41  ;;  %v614_v53 = vunpack.c.l.b16 %v513_v50  ;;  %v535_v3 = vor.u32 %v534_v58, %v531_v56  ;;  %v552_v6 = vshll.u32 %v320_v62, 16  ;;  %v1658_v7 = vld [vmem:[%s1569_s15 + $0x20] sm:$0xf]  ;;  %v322_v28 = vld [vmem:[%s1569_s15 + $0x24] sm:$0x1]  ;;  %v1424_v41 = vld [vmem:[%s1647_s10 + $0x8] sm:$0xff] }
  0x1b   : > { %v1640_v57 = vunpack.c.l.b16 %v527_v52  ;;  %v549_v5 = vor.u32 %v548_v60, %v545_v59  ;;  %v540_v9 = vrot.slane %v538_v4, 5  ;;  %v557_v14 = vshrl.u32 %v1658_v7, 16  ;;  %v324_v29 = vld [vmem:[%s1569_s15 + $0x2c] sm:$0x1]  ;;  %v1359_v30 = vld [vmem:[%s1626_s30 + $0x10] sm:$0xf] }
  0x1c   : > { %v536_v8 = vrot.slane %v535_v3, 4  ;;  %v554_v11 = vrot.slane %v552_v6, 5  ;;  %v560_v15 = vshll.u32 %v1658_v7, 16  ;;  %v571_v16 = vshrl.u32 %v1663_v12, 16  ;;  %v1420_v31 = vld [vmem:[%s1626_s30 + $0x14] sm:$0xf0] }
  0x1d   : > { %v622_v0 = vpack.c.b16 %v1640_v57, %v614_v53  ;;  %v550_v10 = vrot.slane %v549_v5, 4  ;;  %v574_v17 = vshll.u32 %v1663_v12, 16  ;;  %v559_v22 = vrot.slane %v557_v14, 4  ;;  %v1693_v47 = vld [vmem:[%s1569_s15 + $0x30] sm:$0xf] }
  0x1e   : > { %v541_v18 = vsel %vm1615_vm4, %v536_v8, %v540_v9  ;;  %v562_v23 = vrot.slane %v560_v15, 5  ;;  %v573_v26 = vrot.slane %v571_v16, 4  ;;  %v566_v33 = vshll.u32 %v322_v28, 16  ;;  %v1698_v48 = vld [vmem:[%s1569_s15 + $0x38] sm:$0xf]  ;;  %v1425_v15 = vld [vmem:[%s1647_s10 + $0x10] sm:$0xff] }
  0x1f   : > { %v555_v19 = vsel %vm1615_vm4, %v550_v10, %v554_v11  ;;  %v1675_v24 = vunpack.c.l.b16 %v541_v18  ;;  %v576_v27 = vrot.slane %v574_v17, 5  ;;  %v450_v34 = vpack.c.b16 %v444_v21, %v443_v20  ;;  %v1363_v3 = vld [vmem:[%s1626_s30 + $0x20] sm:$0xf]  ;;  %v1421_v4 = vld [vmem:[%s1626_s30 + $0x24] sm:$0xf0] }
  0x20   : > { %v1677_v25 = vunpack.c.l.b16 %v555_v19  ;;  %v563_v32 = vor.u32 %v562_v23, %v559_v22  ;;  %v580_v37 = vshll.u32 %v324_v29, 16  ;;  %v1360_v40 = vor.u32 %v1420_v31, %v1359_v30  ;;  %v340_v22 = vld [vmem:[%s1626_s30] sm:$0xf]  ;;  %v342_v23 = vld [vmem:[%s1626_s30 + $0x8] sm:$0xf] }
  0x21   : > { %v577_v36 = vor.u32 %v576_v27, %v573_v26  ;;  %v568_v44 = vrot.slane %v566_v33, 5  ;;  %v585_v50 = vshrl.u32 %v1693_v47, 16  ;;  %v588_v53 = vshll.u32 %v1693_v47, 16  ;;  %v348_v13 = vld [vmem:[%s1626_s30 + $0x20] sm:$0xf] }
  0x22   : > { %v623_v35 = vpack.c.b16 %v1677_v25, %v1675_v24  ;;  %v564_v43 = vrot.slane %v563_v32, 4  ;;  %v582_v46 = vrot.slane %v580_v37, 5  ;;  %v599_v54 = vshrl.u32 %v1698_v48, 16  ;;  %v1422_v37 = vld [vmem:[%s1626_s30 + $0x34] sm:$0xf0] }
  0x23   : > { %1343 = vmatmul.msk.bf16.vlgmr.msrb.gmra.mxu1 %vm387_vm1, %v449_v63  ;;  %1348 = vmatmul.msk.bf16.vlgmr.msrb.gmra.mxu2 %vm387_vm1, %v622_v0  ;;  %v578_v45 = vrot.slane %v577_v36, 4  ;;  %v602_v55 = vshll.u32 %v1698_v48, 16  ;;  %v445_v56 = vunpack.c.l.b16 %v1658_v7  ;;  %v446_v58 = vunpack.c.l.b16 %v1663_v12  ;;  %v1367_v36 = vld [vmem:[%s1626_s30 + $0x30] sm:$0xf]  ;;  %v350_v38 = vld [vmem:[%s1626_s30 + $0x28] sm:$0xf] }
  0x24   : > { %1369 = vmatmul.msk.bf16.vlgmr.msrb.gmra.mxu3 %vm387_vm1, %v1356_v1  ;;  %1390 = vmatmul.msk.bf16.vlgmr.msrb.gmra.mxu0 %vm387_vm1, %v1423_v2  ;;  %v569_v49 = vsel %vm1615_vm4, %v564_v43, %v568_v44  ;;  %v587_v61 = vrot.slane %v585_v50, 4  ;;  %v590_v62 = vrot.slane %v588_v53, 5  ;;  %v601_v63 = vrot.slane %v599_v54, 4  ;;  %v326_v1 = vld [vmem:[%s1569_s15 + $0x34] sm:$0x1]  ;;  %v1426_v53 = vld [vmem:[%s1647_s10 + $0x18] sm:$0xff] }
  0x25   : > { %v583_v52 = vsel %vm1615_vm4, %v578_v45, %v582_v46  ;;  %v1710_v59 = vunpack.c.l.b16 %v569_v49  ;;  %v604_v0 = vrot.slane %v602_v55, 5  ;;  %v328_v2 = vld [vmem:[%s1569_s15 + $0x3c] sm:$0x1]  ;;  %v451_v5 = vpack.c.b16 %v446_v58, %v445_v56  ;;  %v341_v45 = vld [vmem:[%s1626_s30 + $0x4] sm:$0x1] }
  0x26   : > { %v1712_v60 = vunpack.c.l.b16 %v583_v52  ;;  %v591_v8 = vor.u32 %v590_v62, %v587_v61  ;;  %v594_v9 = vshll.u32 %v326_v1, 16  ;;  %v608_v11 = vshll.u32 %v328_v2, 16  ;;  %v343_v46 = vld [vmem:[%s1626_s30 + $0xc] sm:$0x1] }
  0x27   : > { %v605_v10 = vor.u32 %v604_v0, %v601_v63  ;;  %v1364_v14 = vor.u32 %v1421_v4, %v1363_v3  ;;  %v827_v28 = vshrl.u32 %v340_v22, 16  ;;  %v830_v29 = vshll.u32 %v340_v22, 16  ;;  %v344_v63 = vld [vmem:[%s1626_s30 + $0x10] sm:$0xf]  ;;  %v346_v0 = vld [vmem:[%s1626_s30 + $0x18] sm:$0xf] }
  0x28   : > { %v624_v6 = vpack.c.b16 %v1712_v60, %v1710_v59  ;;  %v592_v16 = vrot.slane %v591_v8, 4  ;;  %v596_v17 = vrot.slane %v594_v9, 5  ;;  %v610_v19 = vrot.slane %v608_v11, 5  ;;  %v345_v22 = vld [vmem:[%s1626_s30 + $0x14] sm:$0x1] }
  0x29   : > { %v606_v18 = vrot.slane %v605_v10, 4  ;;  %v841_v30 = vshrl.u32 %v342_v23, 16  ;;  %v844_v31 = vshll.u32 %v342_v23, 16  ;;  %v447_v32 = vunpack.c.l.b16 %v1693_v47  ;;  %v347_v23 = vld [vmem:[%s1626_s30 + $0x1c] sm:$0x1] }
  0x2a   : > { %v597_v26 = vsel %vm1615_vm4, %v592_v16, %v596_v17  ;;  %v448_v33 = vunpack.c.l.b16 %v1698_v48  ;;  %v1368_v52 = vor.u32 %v1422_v37, %v1367_v36  ;;  %v836_v55 = vshll.u32 %v341_v45, 16  ;;  %v1468_v37 = vld [vmem:[%s1577_s20 + $0x4] sm:$0xff]  }
  0x2b   : > { %v611_v27 = vsel %vm1615_vm4, %v606_v18, %v610_v19  ;;  %v843_v43 = vrot.slane %v841_v30, 4  ;;  %v846_v44 = vrot.slane %v844_v31, 5  ;;  %v850_v62 = vshll.u32 %v343_v46, 16 }
  0x2c   : > { %v452_v49 = vpack.c.b16 %v448_v33, %v447_v32  ;;  %v838_v2 = vrot.slane %v836_v55, 5  ;;  %v869_v8 = vshrl.u32 %v346_v0, 16  ;;  %v872_v9 = vshll.u32 %v346_v0, 16 }
  0x2d   : > { %v847_v61 = vor.u32 %v846_v44, %v843_v43  ;;  %v852_v4 = vrot.slane %v850_v62, 5  ;;  %v1008_v30 = vpack.c.b16 %v443_v20, %v442_v51  ;;  %v1141_v36 = vpack.c.b16 %v1675_v24, %v1640_v57  ;;  %v351_v62 = vld [vmem:[%s1626_s30 + $0x2c] sm:$0x1] }
  0x2e   : > { %v871_v16 = vrot.slane %v869_v8, 4  ;;  %v874_v17 = vrot.slane %v872_v9, 5  ;;  %v883_v20 = vshrl.u32 %v348_v13, 16  ;;  %v886_v24 = vshll.u32 %v348_v13, 16 }
  0x2f   : > { %v848_v3 = vrot.slane %v847_v61, 4  ;;  %v897_v45 = vshrl.u32 %v350_v38, 16  ;;  %v900_v46 = vshll.u32 %v350_v38, 16  ;;  %v349_v61 = vld [vmem:[%s1626_s30 + $0x24] sm:$0x1]  ;;  %v1009_v0 = vpack.c.b16 %v445_v56, %v444_v21 }
  0x30   : > { %v352_v21 = vld [vmem:[%s1626_s30 + $0x30] sm:$0xf]  ;;  %v354_v56 = vld [vmem:[%s1626_s30 + $0x38] sm:$0xf]  ;;  %vm1225_vm5 = vcmask 60416  }
  0x31   : > { %v853_v11 = vsel %vm1615_vm4, %v848_v3, %v852_v4  ;;  %v902_v55 = vrot.slane %v900_v46, 5  ;;  %v906_v4 = vshll.u32 %v351_v62, 16 }
  0x32   : > { %v941_v19 = vunpack.c.l.b16 %v853_v11  ;;  %v911_v11 = vshrl.u32 %v352_v21, 16 }
  0x33   : > { %1344 = vmatmul.msk.bf16.gmra.mxu1 %vm387_vm1, %v450_v34  ;;  %1349 = vmatmul.msk.bf16.gmra.mxu2 %vm387_vm1, %v623_v35  ;;  %v1737_v34 = vunpack.c.l.b16 %v597_v26  ;;  %v1739_v35 = vunpack.c.l.b16 %v611_v27  ;;  %v864_v27 = vshll.u32 %v345_v22, 16  ;;  %v908_v7 = vrot.slane %v906_v4, 5 }
  0x34   : > { %1370 = vmatmul.msk.bf16.gmra.mxu3 %vm387_vm1, %v1360_v40  ;;  %1391 = vmatmul.msk.bf16.gmra.mxu0 %vm387_vm1, %v1424_v41  ;;  %v829_v40 = vrot.slane %v827_v28, 4  ;;  %v832_v41 = vrot.slane %v830_v29, 5  ;;  %v875_v28 = vor.u32 %v874_v17, %v871_v16  ;;  %v878_v29 = vshll.u32 %v347_v23, 16 }
  0x35   : > { %v625_v50 = vpack.c.b16 %v1739_v35, %v1737_v34  ;;  %v928_v16 = vshll.u32 %v354_v56, 16  ;;  %v913_v23 = vrot.slane %v911_v11, 4 }
  0x36   : > { %v833_v54 = vor.u32 %v832_v41, %v829_v40  ;;  %v866_v41 = vrot.slane %v864_v27, 5  ;;  %v876_v43 = vrot.slane %v875_v28, 4  ;;  %v880_v44 = vrot.slane %v878_v29, 5  ;;  %v353_v29 = vld [vmem:[%s1626_s30 + $0x34] sm:$0x1] }
  0x37   : > { %v930_v28 = vrot.slane %v928_v16, 5  ;;  %v920_v38 = vshll.u32 %v353_v29, 16 }
  0x38   : > { %v834_v1 = vrot.slane %v833_v54, 4  ;;  %v881_v57 = vsel %vm1615_vm4, %v876_v43, %v880_v44  ;;  %v899_v54 = vrot.slane %v897_v45, 4  ;;  %v1143_v43 = vpack.c.b16 %v1737_v34, %v1712_v60  ;;  %v1472_v44 = vld [vmem:[%s1577_s20 + $0x14] sm:$0xff]  }
  0x39   : > { %v922_v47 = vrot.slane %v920_v38, 5 }
  0x3a   : > { %v839_v10 = vsel %vm1615_vm4, %v834_v1, %v838_v2  ;;  %v892_v2 = vshll.u32 %v349_v61, 16  ;;  %v903_v3 = vor.u32 %v902_v55, %v899_v54 }
  0x3b   : > { %v940_v18 = vunpack.c.l.b16 %v839_v10  ;;  %v329_v10 = vld [vmem:[%s1569_s15 + $0x40] sm:$0xf] }
  0x3c   : > { %v894_v42 = vrot.slane %v892_v2, 5  ;;  %v904_v9 = vrot.slane %v903_v3, 4  ;;  %v1125_v17 = vshrl.u32 %v329_v10, 16 }
  0x3d   : > { %v948_v31 = vpack.c.b16 %v941_v19, %v940_v18  ;;  %v1128_v18 = vshll.u32 %v329_v10, 16 }
  0x43   : > { %1345 = vmatmul.msk.bf16.gmra.mxu1 %vm387_vm1, %v451_v5  ;;  %1350 = vmatmul.msk.bf16.gmra.mxu2 %vm387_vm1, %v624_v6  ;;  %v855_v5 = vshrl.u32 %v344_v63, 16  ;;  %v858_v6 = vshll.u32 %v344_v63, 16 }
  0x44   : > { %1371 = vmatmul.msk.bf16.gmra.mxu3 %vm387_vm1, %v1364_v14  ;;  %1392 = vmatmul.msk.bf16.gmra.mxu0 %vm387_vm1, %v1425_v15 }
  0x45   : > { %v857_v14 = vrot.slane %v855_v5, 4  ;;  %v860_v15 = vrot.slane %v858_v6, 5  ;;  %v1470_v5 = vld [vmem:[%s1577_s20 + $0xc] sm:$0xff]   ;;  %v1142_v6 = vpack.c.b16 %v1710_v59, %v1677_v25  ;;  %v909_v59 = vsel %vm1615_vm4, %v904_v9, %v908_v7 }
  0x46   : > { %v945_v22 = vunpack.c.l.b16 %v909_v59 }
  0x47   : > { %v861_v26 = vor.u32 %v860_v15, %v857_v14  ;;  %v914_v14 = vshll.u32 %v352_v21, 16  ;;  %v925_v15 = vshrl.u32 %v354_v56, 16 }
  0x49   : > { %v862_v40 = vrot.slane %v861_v26, 4  ;;  %v916_v26 = vrot.slane %v914_v14, 5  ;;  %v927_v27 = vrot.slane %v925_v15, 4 }
  0x4b   : > { %v867_v51 = vsel %vm1615_vm4, %v862_v40, %v866_v41  ;;  %v1010_v41 = vpack.c.b16 %v447_v32, %v446_v58  ;;  %v917_v13 = vor.u32 %v916_v26, %v913_v23 }
  0x4d   : > { %v918_v12 = vrot.slane %v917_v13, 4 }
  0x4f   : > { %v923_v45 = vsel %vm1615_vm4, %v918_v12, %v922_v47 }
  0x53   : > { %1346 = vmatmul.msk.bf16.gmra.mxu1 %vm387_vm1, %v452_v49  ;;  %1351 = vmatmul.msk.bf16.gmra.mxu2 %vm387_vm1, %v625_v50  ;;  %v942_v49 = vunpack.c.l.b16 %v867_v51  ;;  %v943_v50 = vunpack.c.l.b16 %v881_v57  ;;  %v931_v51 = vor.u32 %v930_v28, %v927_v27 }
  0x54   : > { %1372 = vmatmul.msk.bf16.gmra.mxu3 %vm387_vm1, %v1368_v52  ;;  %1393 = vmatmul.msk.bf16.gmra.mxu0 %vm387_vm1, %v1426_v53  ;;  %v885_v52 = vrot.slane %v883_v20, 4  ;;  %v888_v53 = vrot.slane %v886_v24, 5 }
  0x55   : > { %v949_v63 = vpack.c.b16 %v943_v50, %v942_v49  ;;  %v932_v58 = vrot.slane %v931_v51, 4  ;;  %v946_v50 = vunpack.c.l.b16 %v923_v45 }
  0x56   : > { %v889_v1 = vor.u32 %v888_v53, %v885_v52  ;;  %v1007_v53 = vunpack.c.l.b16 %v329_v10 }
  0x58   : > { %v890_v8 = vrot.slane %v889_v1, 4  ;;  %v1011_v61 = vpack.c.b16 %v1007_v53, %v448_v33 }
  0x5a   : > { %v895_v25 = vsel %vm1615_vm4, %v890_v8, %v894_v42 }
  0x5b   : > { %v944_v19 = vunpack.c.l.b16 %v895_v25 }
  0x5d   : > { %v950_v40 = vpack.c.b16 %v945_v22, %v944_v19 }
  0x63   : > { %1395 = vmatmul.msk.bf16.vlgmr.msra.gmra.mxu1 %vm387_vm1, %v948_v31  ;;  %1400 = vmatmul.msk.bf16.vlgmr.msra.gmra.mxu2 %vm387_vm1, %v1008_v30  ;;  %v355_v30 = vld [vmem:[%s1626_s30 + $0x3c] sm:$0x1]  ;;  %v1127_v31 = vrot.slane %v1125_v17, 4 }
  0x64   : > { %1405 = vmatmul.msk.bf16.vlgmr.msra.gmra.mxu3 %vm387_vm1, %v1468_v37  ;;  %1410 = vmatmul.msk.bf16.vlgmr.msra.gmra.mxu0 %vm387_vm1, %v1141_v36  ;;  %v1130_v36 = vrot.slane %v1128_v18, 5  ;;  %v330_v37 = vld [vmem:[%s1569_s15 + $0x44] sm:$0x1]  ;;  %v934_v57 = vshll.u32 %v355_v30, 16  ;;  %s1884_s15 = scalar_lea.vmem %s1940_s6, %s1417_s7 }
  0x65   : > { %v1134_v24 = vshll.u32 %v330_v37, 16 }
  0x66   : > { %v1131_v20 = vor.u32 %v1130_v36, %v1127_v31  ;;  %v936_v60 = vrot.slane %v934_v57, 5 }
  0x67   : > { %v1136_v34 = vrot.slane %v1134_v24, 5 }
  0x68   : > { %v1132_v32 = vrot.slane %v1131_v20, 4  ;;  %v937_v46 = vsel %vm1615_vm4, %v932_v58, %v936_v60 }
  0x69   : > { %v947_v52 = vunpack.c.l.b16 %v937_v46 }
  0x6a   : > { %v1137_v49 = vsel %vm1615_vm4, %v1132_v32, %v1136_v34 }
  0x6b   : > { %v1140_v54 = vunpack.c.l.b16 %v1137_v49  ;;  %v951_v55 = vpack.c.b16 %v947_v52, %v946_v50  ;;  %v1876_v50 = vld [vmem:[%s1939_s5] ss:$0 sm:$0xff] }
  0x73   : > { %1396 = vmatmul.msk.bf16.gmra.mxu1 %vm387_vm1, %v949_v63  ;;  %1401 = vmatmul.msk.bf16.gmra.mxu2 %vm387_vm1, %v1009_v0  ;;  %v1473_v63 = vld [vmem:[%s1577_s20 + $0x1c] sm:$0xff]  ;;  %v1144_v0 = vpack.c.b16 %v1140_v54, %v1739_v35 }
  0x74   : > { %1406 = vmatmul.msk.bf16.gmra.mxu3 %vm387_vm1, %v1470_v5  ;;  %1411 = vmatmul.msk.bf16.gmra.mxu0 %vm387_vm1, %v1142_v6 }
  0x83   : > { %1397 = vmatmul.msk.bf16.gmra.mxu1 %vm387_vm1, %v950_v40  ;;  %1402 = vmatmul.msk.bf16.gmra.mxu2 %vm387_vm1, %v1010_v41 }
  0x84   : > { %1407 = vmatmul.msk.bf16.gmra.mxu3 %vm387_vm1, %v1472_v44  ;;  %1412 = vmatmul.msk.bf16.gmra.mxu0 %vm387_vm1, %v1143_v43 }
  0x90   : > { %v418_v62 = vpop.f32.mrf.mxu1 }
  0x91   : > { %v413_v1 = vpop.f32.mrf.mxu0 }
  0x93   : > { %1398 = vmatmul.msk.bf16.gmra.mxu1 %vm387_vm1, %v951_v55  ;;  %1403 = vmatmul.msk.bf16.gmra.mxu2 %vm387_vm1, %v1011_v61 }
  0x94   : > { %1408 = vmatmul.msk.bf16.gmra.mxu3 %vm387_vm1, %v1473_v63  ;;  %1413 = vmatmul.msk.bf16.gmra.mxu0 %vm387_vm1, %v1144_v0 }
  0x96   : > { %v1829_v39 = vpop.f32.mrf.mxu2 }
  0x97   : > { %v1831_v2 = vpop.f32.mrf.mxu3 }
  0x98   : > { %v1833_v3 = vpop.f32.mrf.mxu1 }
  0x99   : > { %v415_v48 = vpop.f32.mrf.mxu0 }
  0x9e   : > { %v1835_v33 = vpop.f32.mrf.mxu2 }
  0x9f   : > { %v1837_v4 = vpop.f32.mrf.mxu3 }
  0xa0   : > { %v477_v35 = vpop.f32.mrf.mxu1 }
  0xa1   : > { %v798_v5 = vpop.f32.mrf.mxu0  ;;  %v478_v40 = vadd.f32 %v477_v35, %v413_v1 }
  0xa6   : > { %v650_v6 = vpop.f32.mrf.mxu2 }
  0xa7   : > { %v724_v8 = vpop.f32.mrf.mxu3  ;;  %v670_v43 = vadd.f32 %v650_v6, %v478_v40 }
  0xa8   : > { %v479_v42 = vpop.f32.mrf.mxu1 }
  0xa9   : > { %v800_v9 = vpop.f32.mrf.mxu0  ;;  %v744_v13 = vadd.f32 %v724_v8, %v670_v43  ;;  %v480_v57 = vadd.f32 %v479_v42, %v415_v48 }
  0xab   : > { %v818_v12 = vadd.f32 %v798_v5, %v744_v13 }
  0xae   : > { %v652_v7 = vpop.f32.mrf.mxu2 }
  0xaf   : > { %v726_v21 = vpop.f32.mrf.mxu3  ;;  %v671_v24 = vadd.f32 %v652_v7, %v480_v57 }
  0xb0   : > { %v482_v56 = vpop.f32.mrf.mxu1 }
  0xb1   : > { %v803_v10 = vpop.f32.mrf.mxu0  ;;  %v745_v60 = vadd.f32 %v726_v21, %v671_v24  ;;  %v483_v46 = vadd.f32 %v482_v56, %v418_v62 }
  0xb3   : > { %v819_v55 = vadd.f32 %v800_v9, %v745_v60 }
  0xb6   : > { %v655_v25 = vpop.f32.mrf.mxu2 }
  0xb7   : > { %v729_v59 = vpop.f32.mrf.mxu3  ;;  %v672_v53 = vadd.f32 %v655_v25, %v483_v46 }
  0xb8   : > { %v484_v11 = vpop.f32.mrf.mxu1 }
  0xb9   : > { %v1839_v14 = vpop.f32.mrf.mxu0  ;;  %v746_v1 = vadd.f32 %v729_v59, %v672_v53  ;;  %v485_v6 = vadd.f32 %v484_v11, %v1833_v3 }
  0xbb   : > { %v820_v56 = vadd.f32 %v803_v10, %v746_v1 }
  0xbe   : > { %v657_v15 = vpop.f32.mrf.mxu2 }
  0xbf   : > { %v731_v16 = vpop.f32.mrf.mxu3  ;;  %v673_v7 = vadd.f32 %v657_v15, %v485_v6 }
  0xc0   : > { %v1841_v17 = vpop.f32.mrf.mxu1 }
  0xc1   : > { %v1843_v18 = vpop.f32.mrf.mxu0  ;;  %v747_v43 = vadd.f32 %v731_v16, %v673_v7  ;;  %v488_v3 = vadd.f32 %v1841_v17, %v1829_v39 }
  0xc6   : > { %v1845_v19 = vpop.f32.mrf.mxu2 }
  0xc7   : > { %v1847_v22 = vpop.f32.mrf.mxu3 }
  0xc8   : > { %v1849_v23 = vpop.f32.mrf.mxu1 }
  0xc9   : > { %v1851_v26 = vpop.f32.mrf.mxu0  ;;  %v490_v46 = vadd.f32 %v1849_v23, %v1835_v33 }
  0xce   : > { %v1853_v27 = vpop.f32.mrf.mxu2 }
  0xcf   : > { %v1855_v28 = vpop.f32.mrf.mxu3 }
  0xd0   : > { %v1857_v29 = vpop.f32.mrf.mxu1 }
  0xd1   : > { %v1859_v30 = vpop.f32.mrf.mxu0 }
  0xd6   : > { %v1861_v31 = vpop.f32.mrf.mxu2 }
  0xd7   : > { %v1863_v36 = vpop.f32.mrf.mxu3 }
  0xd8   : > { %v1865_v37 = vpop.f32.mrf.mxu1 }
  0xd9   : > { %v1867_v41 = vpop.f32.mrf.mxu0 }
  0xde   : > { %v1869_v44 = vpop.f32.mrf.mxu2 }
  0xdf   : > { %v1871_v38 = vpop.f32.mrf.mxu3 }
  0xe0   : > { %v976_v51 = vpop.f32.mrf.mxu1 }
  0xe1   : > { %v1169_v20 = vpop.f32.mrf.mxu0  ;;  %v996_v47 = vadd.f32 %v976_v51, %v818_v12  ;;  %v674_v12 = vadd.f32 %v1845_v19, %v488_v3 }
  0xe6   : > { %v1036_v58 = vpop.f32.mrf.mxu2 }
  0xe7   : > { %v1056_v32 = vadd.f32 %v1036_v58, %v996_v47  ;;  %v1096_v34 = vpop.f32.mrf.mxu3  ;;  %v821_v47 = vadd.f32 %v1839_v14, %v747_v43 }
  0xe8   : > { %v978_v45 = vpop.f32.mrf.mxu1 }
  0xe9   : > { %v1116_v49 = vadd.f32 %v1096_v34, %v1056_v32  ;;  %v1171_v52 = vpop.f32.mrf.mxu0  ;;  %v997_v63 = vadd.f32 %v978_v45, %v819_v55  ;;  %v748_v32 = vadd.f32 %v1847_v22, %v674_v12 }
  0xeb   : > { %v1189_v54 = vadd.f32 %v1169_v20, %v1116_v49  ;;  %v822_v53 = vadd.f32 %v1843_v18, %v748_v32 }
  0xed   : > { %v1201_v61 = vadd.f32 %v1876_v50, %v1189_v54 }
  0xee   : > { %v1038_v0 = vpop.f32.mrf.mxu2 }
  0xef   : > { %v1209_v48 = vmax.f32 %v1201_v61, 0.0  ;;  %v1057_v35 = vadd.f32 %v1038_v0, %v997_v63  ;;  %v1098_v5 = vpop.f32.mrf.mxu3 }
  0xf0   : > { %v981_v62 = vpop.f32.mrf.mxu1 }
  0xf1   : > { %v1217_v8 = vpack.c.bf16 %v1209_v48, %v1209_v48  ;;  %v1117_v42 = vadd.f32 %v1098_v5, %v1057_v35  ;;  %v1174_v9 = vpop.f32.mrf.mxu0  ;;  %v998_v59 = vadd.f32 %v981_v62, %v820_v56 }
  0xf3   : > { %1226 = vst.msk [vmem:[%s1884_s15] sm:$0xf] %vm1225_vm5, %v1217_v8  ;;  %v1190_v21 = vadd.f32 %v1171_v52, %v1117_v42  ;;  %v675_v52 = vadd.f32 %v1853_v27, %v490_v46  ;;  %v493_v27 = vadd.f32 %v1857_v29, %v1831_v2 }
  0xf5   : > { %v1202_v25 = vadd.f32 %v1876_v50, %v1190_v21  ;;  %v749_v63 = vadd.f32 %v1855_v28, %v675_v52  ;;  %v676_v5 = vadd.f32 %v1861_v31, %v493_v27  ;;  %v495_v31 = vadd.f32 %v1865_v37, %v1837_v4 }
  0xf6   : > { %v1041_v40 = vpop.f32.mrf.mxu2 }
  0xf7   : > { %v1210_v13 = vmax.f32 %v1202_v25, 0.0  ;;  %v1058_v51 = vadd.f32 %v1041_v40, %v998_v59  ;;  %v1101_v57 = vpop.f32.mrf.mxu3  ;;  %v823_v62 = vadd.f32 %v1851_v26, %v749_v63  ;;  %v677_v59 = vadd.f32 %v1869_v44, %v495_v31 }
  0xf8   : > { %v983_v20 = vpop.f32.mrf.mxu1 }
  0xf9   : > { %v1218_v11 = vpack.c.bf16 %v1210_v13, %v1210_v13  ;;  %v1118_v24 = vadd.f32 %v1101_v57, %v1058_v51  ;;  %v1176_v15 = vpop.f32.mrf.mxu0  ;;  %v999_v58 = vadd.f32 %v983_v20, %v821_v47  ;;  %v751_v51 = vadd.f32 %v1871_v38, %v677_v59 }
  0xfb   : > { %1227 = vst.msk [vmem:[%s1884_s15 + $0x4] sm:$0xf] %vm1225_vm5, %v1218_v11  ;;  %v1191_v10 = vadd.f32 %v1174_v9, %v1118_v24  ;;  %v750_v9 = vadd.f32 %v1863_v36, %v676_v5 }
  0xfd   : > { %v1203_v16 = vadd.f32 %v1876_v50, %v1191_v10  ;;  %v824_v40 = vadd.f32 %v1859_v30, %v750_v9  ;;  %v825_v30 = vadd.f32 %v1867_v41, %v751_v51 }
  0xfe   : > { %v1043_v60 = vpop.f32.mrf.mxu2 }
  0xff   : > { %v1211_v34 = vmax.f32 %v1203_v16, 0.0  ;;  %v1059_v45 = vadd.f32 %v1043_v60, %v999_v58  ;;  %v1103_v39 = vpop.f32.mrf.mxu3 }
 0x100   : > { %v986_v17 = vpop.f32.mrf.mxu1 }
 0x101   : > { %v1219_v19 = vpack.c.bf16 %v1211_v34, %v1211_v34  ;;  %v1119_v49 = vadd.f32 %v1103_v39, %v1059_v45  ;;  %v1179_v54 = vpop.f32.mrf.mxu0  ;;  %v1000_v55 = vadd.f32 %v986_v17, %v822_v53 }
 0x103   : > { %1228 = vst.msk [vmem:[%s1884_s15 + $0x8] sm:$0xf] %vm1225_vm5, %v1219_v19  ;;  %v1192_v14 = vadd.f32 %v1176_v15, %v1119_v49 }
 0x105   : > { %v1204_v22 = vadd.f32 %v1876_v50, %v1192_v14 }
 0x106   : > { %v1046_v61 = vpop.f32.mrf.mxu2 }
 0x107   : > { %v1212_v0 = vmax.f32 %v1204_v22, 0.0  ;;  %v1060_v1 = vadd.f32 %v1046_v61, %v1000_v55  ;;  %v1106_v33 = vpop.f32.mrf.mxu3 }
 0x108   : > { %v988_v23 = vpop.f32.mrf.mxu1 }
 0x109   : > { %v1220_v48 = vpack.c.bf16 %v1212_v0, %v1212_v0  ;;  %v1120_v35 = vadd.f32 %v1106_v33, %v1060_v1  ;;  %v1001_v28 = vadd.f32 %v988_v23, %v823_v62  ;;  %v1181_v8 = vpop.f32.mrf.mxu0 }
 0x10b   : > { %1229 = vst.msk [vmem:[%s1884_s15 + $0xc] sm:$0xf] %vm1225_vm5, %v1220_v48  ;;  %v1193_v18 = vadd.f32 %v1179_v54, %v1120_v35 }
 0x10d   : > { %v1205_v6 = vadd.f32 %v1876_v50, %v1193_v18 }
 0x10e   : > { %v1048_v42 = vpop.f32.mrf.mxu2 }
 0x10f   : > { %v1213_v7 = vmax.f32 %v1205_v6, 0.0  ;;  %v1061_v21 = vadd.f32 %v1048_v42, %v1001_v28  ;;  %v1108_v2 = vpop.f32.mrf.mxu3 }
 0x110   : > { %v991_v29 = vpop.f32.mrf.mxu1 }
 0x111   : > { %v1221_v56 = vpack.c.bf16 %v1213_v7, %v1213_v7  ;;  %v1121_v25 = vadd.f32 %v1108_v2, %v1061_v21  ;;  %v1002_v36 = vadd.f32 %v991_v29, %v824_v40  ;;  %v1184_v4 = vpop.f32.mrf.mxu0 }
 0x113   : > { %1230 = vst.msk [vmem:[%s1884_s15 + $0x10] sm:$0xf] %vm1225_vm5, %v1221_v56  ;;  %v1194_v26 = vadd.f32 %v1181_v8, %v1121_v25 }
 0x115   : > { %v1206_v43 = vadd.f32 %v1876_v50, %v1194_v26 }
 0x116   : > { %v1051_v13 = vpop.f32.mrf.mxu2 }
 0x117   : > { %v1214_v57 = vmax.f32 %v1206_v43, 0.0  ;;  %v1062_v20 = vadd.f32 %v1051_v13, %v1002_v36  ;;  %v1111_v3 = vpop.f32.mrf.mxu3 }
 0x118   : > { %v993_v24 = vpop.f32.mrf.mxu1 }
 0x119   : > { %v1222_v37 = vpack.c.bf16 %v1214_v57, %v1214_v57  ;;  %v1122_v11 = vadd.f32 %v1111_v3, %v1062_v20  ;;  %v1003_v12 = vadd.f32 %v993_v24, %v825_v30  ;;  %v1186_v32 = vpop.f32.mrf.mxu0 }
 0x11b   : > { %1231 = vst.msk [vmem:[%s1884_s15 + $0x14] sm:$0xf] %vm1225_vm5, %v1222_v37  ;;  %v1195_v44 = vadd.f32 %v1184_v4, %v1122_v11 }
 0x11d   : > { %v1207_v15 = vadd.f32 %v1876_v50, %v1195_v44 }
 0x11e   : > { %v1053_v10 = vpop.f32.mrf.mxu2 }
 0x11f   : > { %v1215_v47 = vmax.f32 %v1207_v15, 0.0  ;;  %v1063_v38 = vadd.f32 %v1053_v10, %v1003_v12  ;;  %v1113_v16 = vpop.f32.mrf.mxu3 }
 0x121   : > { %v1223_v58 = vpack.c.bf16 %v1215_v47, %v1215_v47  ;;  %v1123_v60 = vadd.f32 %v1113_v16, %v1063_v38 }
 0x123   : > { %1232 = vst.msk [vmem:[%s1884_s15 + $0x18] sm:$0xf] %vm1225_vm5, %v1223_v58  ;;  %v1196_v34 = vadd.f32 %v1186_v32, %v1123_v60 }
 0x125   : > { %v1208_v45 = vadd.f32 %v1876_v50, %v1196_v34 }
 0x127   : > { %v1216_v39 = vmax.f32 %v1208_v45, 0.0 }
 0x129   : > { %v1224_v17 = vpack.c.bf16 %v1216_v39, %v1216_v39 }
 0x12b   : > { %1233 = vst.msk [vmem:[%s1884_s15 + $0x1c] sm:$0xf] %vm1225_vm5, %v1224_v17 }
 0x12c PF: > { %s16_s21 = sadd.s32 1, %s1494_s21  }
 0x12d   : > { %p13_p4 = scmp.ge.s32.totalorder %s16_s21, 4  }
 0x12f   :  { %15 = sbr.rel (!%p13_p4) target bundleno = 1 (0x1), region = 91 }

</bundles_post_ra>
